<compile_context>
chip_gen: v6e
topology: v6e:2x2x1
jax: 0.10.0
libtpu: 0.0.40
codegen_flags: <defaults>
</compile_context>

<pallas_src>
import functools

import jax
import jax.numpy as jnp
from jax import lax
from jax.experimental import pallas as pl
from jax.experimental.pallas import tpu as pltpu  # noqa: F401  (TPU backend assumed)


# param-slab row layout (per head t); lanes used per row:
#   0: bpa = bp @ wa + ba            [0:H]
#   1: LayerNorm gamma               [0:H]
#   2: LayerNorm beta                [0:H]
#   3: MLP b1 (BN folded)            [0:D1]
#   4: MLP b2 (BN folded)            [0:D2]
#   5: MLP w3 (as a row vector)      [0:D2]
#   6: MLP b3                        [0:1]
#   7: padding (keeps score rows sublane-aligned)
#   8 .. 8+A*B-1: additive score mask (0 valid / -1e30 padded), lane 0
_SCORE_ROW0 = 8


# ----------------------------- fused Pallas kernel -----------------------------

def _fused_kernel(comb_ref, wpa_ref, w1_ref, w2_ref, slab_ref, out_ref, *,
                  num_aux, batch, temperature, ln_eps):
    # comb_ref : (T, A*B + B, D) bf16  rows [a*B + b] = aux(batch b, inst a),
    #                                  rows [A*B + b] = target(batch b)
    # wpa_ref  : (T, D, H) bf16        folded projection+attention weight
    # w1_ref   : (T, H, D1) bf16       MLP layer 1 (BN folded)
    # w2_ref   : (T, D1, D2) bf16      MLP layer 2 (BN folded)
    # slab_ref : (T, 8+A*B, 256) f32   packed small params (layout above)
    # out_ref  : (B, T) f32
    A, B = num_aux, batch
    T = comb_ref.shape[0]
    H = wpa_ref.shape[-1]
    D1 = w1_ref.shape[-1]
    D2 = w2_ref.shape[-1]
    inv_temp = 1.0 / temperature

    preds = []
    for t in range(T):                               # statically unrolled (T == 3)
        comb = comb_ref[t]                           # (R, D) bf16
        wpa = wpa_ref[t]                             # (D, H) bf16

        bpa = slab_ref[t, 0:1, 0:H]                  # (1, H)  f32
        ln_g = slab_ref[t, 1:2, 0:H]
        ln_b = slab_ref[t, 2:3, 0:H]
        b1 = slab_ref[t, 3:4, 0:D1]
        b2 = slab_ref[t, 4:5, 0:D2]
        w3 = slab_ref[t, 5:6, 0:D2]
        b3 = slab_ref[t, 6:7, 0:1]
        sbias = slab_ref[t, _SCORE_ROW0:_SCORE_ROW0 + A * B, 0:1]   # (A*B, 1)

        # folded projection+attention: one matmul covers aux and target rows.
        att = jnp.dot(comb, wpa, preferred_element_type=jnp.float32) + bpa   # (R, H)
        att_aux = att[:A * B]                        # (A*B, H), grouped by aux index a
        tgt = att[A * B:]                            # (B, H)

        # all A*B attention scores: ONE multiply + ONE lane reduction.
        tgt_rep = jnp.concatenate([tgt] * A, axis=0)                    # (A*B, H)
        raw = jnp.sum(att_aux * tgt_rep, axis=-1, keepdims=True)        # (A*B, 1)
        # padded instances get -1e30 (finite -> no NaN even if a batch row has
        # no valid aux instance; softmax then degenerates to uniform weights).
        scores = raw * inv_temp + sbias

        # softmax over the A aux instances (tile-aligned (B,1) group slices).
        m = scores[0:B]
        for a in range(1, A):
            m = jnp.maximum(m, scores[a * B:(a + 1) * B])
        e = jnp.exp(scores - jnp.concatenate([m] * A, axis=0))          # one EUP exp
        den = e[0:B]
        for a in range(1, A):
            den = den + e[a * B:(a + 1) * B]
        inv = pl.reciprocal(den, approx=True)                           # (B, 1)
        w_col = e * jnp.concatenate([inv] * A, axis=0)                  # (A*B, 1)

        watt = w_col * att_aux                                          # (A*B, H)
        weighted = watt[0:B]
        for a in range(1, A):
            weighted = weighted + watt[a * B:(a + 1) * B]               # (B, H)

        # LayerNorm(att_hidden_dim)
        mu = jnp.mean(weighted, axis=-1, keepdims=True)
        xc = weighted - mu
        var = jnp.mean(xc * xc, axis=-1, keepdims=True)
        normed = xc * lax.rsqrt(var + ln_eps) * ln_g + ln_b             # (B, H)

        # prediction MLP (eval BatchNorm folded into w1/b1, w2/b2; dropout = id)
        h = jnp.dot(normed.astype(w1_ref.dtype), w1_ref[t],
                    preferred_element_type=jnp.float32) + b1
        h = jnp.maximum(h, 0.0)
        h = jnp.dot(h.astype(w2_ref.dtype), w2_ref[t],
                    preferred_element_type=jnp.float32) + b2
        h = jnp.maximum(h, 0.0)
        # final Linear(D2, 1) as VPU multiply + lane reduction (no 1-column MXU op)
        preds.append(jnp.sum(h * w3, axis=-1, keepdims=True) + b3)      # (B, 1)

    out_ref[...] = jnp.concatenate(preds, axis=-1)                      # (B, T), 1 store


# ----------------------------- Pallas wrapper -----------------------------

def run_fused(comb, wpa, w1, w2, slab, *, num_aux, batch, temperature):
    T, R, D = comb.shape
    H = wpa.shape[-1]
    D1 = w1.shape[-1]
    D2 = w2.shape[-1]
    S, L = slab.shape[1], slab.shape[2]
    kernel = functools.partial(_fused_kernel, num_aux=num_aux, batch=batch,
                               temperature=float(temperature), ln_eps=1e-5)
    return pl.pallas_call(
        kernel,
        out_shape=jax.ShapeDtypeStruct((batch, T), jnp.float32),
        grid=(1,),                                        # single invocation
        in_specs=[
            pl.BlockSpec((T, R, D), lambda i: (0, 0, 0)),     # combined aux+target rows
            pl.BlockSpec((T, D, H), lambda i: (0, 0, 0)),     # folded proj+attention W
            pl.BlockSpec((T, H, D1), lambda i: (0, 0, 0)),    # MLP w1 (BN folded)
            pl.BlockSpec((T, D1, D2), lambda i: (0, 0, 0)),   # MLP w2 (BN folded)
            pl.BlockSpec((T, S, L), lambda i: (0, 0, 0)),     # packed param slab
        ],
        out_specs=pl.BlockSpec((batch, T), lambda i: (0, 0)),
    )(comb, wpa, w1, w2, slab)


# ----------------------------- plain-JAX glue -----------------------------

def masked_embedding(x_idx, emb_mat):
    n_emb = emb_mat.shape[0]
    idx = jnp.clip(x_idx, 0, n_emb - 1).astype(jnp.int32)
    emb = emb_mat[idx]
    mask = (idx > 0).astype(emb.dtype)[..., None]
    return emb * mask


def prepare_target_embed(x_one, x_mul, emb_mat):
    B = x_one.shape[0]
    e_one = masked_embedding(x_one, emb_mat).reshape(B, -1)
    e_mul = masked_embedding(x_mul, emb_mat).sum(axis=2).reshape(B, -1)
    return jnp.concatenate([e_one, e_mul], axis=1)


def prepare_aux_embed(x_one_aux, x_mul_aux, emb_mat):
    # x_one_aux: (T,B,A,n_one)  x_mul_aux: (T,B,A,n_mul,m)
    T, B, A = x_one_aux.shape[:3]
    e_one = masked_embedding(x_one_aux, emb_mat).reshape(T, B, A, -1)
    e_mul = masked_embedding(x_mul_aux, emb_mat).sum(axis=4).reshape(T, B, A, -1)
    return jnp.concatenate([e_one, e_mul], axis=3)


def forward(params, x_one, x_mul, x_one_aux, x_mul_aux, temperature):
    cd = jnp.bfloat16  # MXU operand dtype; accumulation stays f32

    target_embed = prepare_target_embed(x_one, x_mul, params["emb"])        # (B, D)
    aux_embed = prepare_aux_embed(x_one_aux, x_mul_aux, params["emb"])      # (T, B, A, D)
    T, B, A, D = aux_embed.shape
    H = params["wp"].shape[-1]

    # layout once in XLA-land: rows grouped by aux index a, then target rows appended
    aux_flat = jnp.transpose(aux_embed, (0, 2, 1, 3)).reshape(T, A * B, D)
    tgt_rep = jnp.broadcast_to(target_embed[None], (T, B, D))
    comb = jnp.concatenate([aux_flat, tgt_rep], axis=1).astype(cd)          # (T, R, D)

    # fold projection + attention linears: att = x @ (wp@wa) + (bp@wa + ba)
    wpa = jnp.einsum("tdh,thg->tdg", params["wp"], params["wa"]).astype(cd)  # (T, D, H)
    bpa = jnp.einsum("th,thg->tg", params["bp"], params["wa"]) + params["ba"]

    # validity mask exactly as the reference: abs-sum of the *projected* aux
    # embedding (projection bias included) > 0, turned into an additive score bias.
    proj_aux = jnp.einsum("trd,tdh->trh", aux_flat, params["wp"]) + params["bp"][:, None, :]
    valid = jnp.sum(jnp.abs(proj_aux), axis=-1) > 0.0                       # (T, A*B)
    score_bias = jnp.where(valid, 0.0, -1e30)

    # fold eval-mode BatchNorm into the prediction-MLP Linears
    mlp = params["mlp"]
    eps = 1e-5
    s1 = mlp["g1"] * lax.rsqrt(mlp["rv1"] + eps)                            # (3, 256)
    w1f = (mlp["w1"] * s1[:, None, :]).astype(cd)
    b1f = (mlp["b1"] - mlp["rm1"]) * s1 + mlp["be1"]
    s2 = mlp["g2"] * lax.rsqrt(mlp["rv2"] + eps)                            # (3, 128)
    w2f = (mlp["w2"] * s2[:, None, :]).astype(cd)
    b2f = (mlp["b2"] - mlp["rm2"]) * s2 + mlp["be2"]
    w3row = mlp["w3"][:, :, 0]                                              # (3, 128)
    b3 = mlp["b3"]                                                          # (3, 1)

    # pack all small per-head vectors + the score mask into ONE lane-dense f32 slab
    lanes = max(H, b1f.shape[-1], b2f.shape[-1])                            # 256

    def _row(v):                                                            # (T, n) -> (T, 1, lanes)
        v = v.astype(jnp.float32)
        return jnp.pad(v, ((0, 0), (0, lanes - v.shape[-1])))[:, None, :]

    score_rows = jnp.pad(score_bias[..., None].astype(jnp.float32),
                         ((0, 0), (0, 0), (0, lanes - 1)))                  # (T, A*B, lanes)
    slab = jnp.concatenate(
        [_row(bpa),
         _row(jnp.broadcast_to(params["ln_g"], (T, H))),
         _row(jnp.broadcast_to(params["ln_b"], (T, H))),
         _row(b1f), _row(b2f), _row(w3row), _row(b3),
         _row(jnp.zeros((T, 1), jnp.float32)),      # pad row -> score rows sublane-aligned
         score_rows],
        axis=1).astype(jnp.float32)                                         # (T, 8+A*B, 256)

    preds = run_fused(comb, wpa, w1f, w2f, slab,
                      num_aux=A, batch=B, temperature=temperature)          # (B, T)

    y_ctxt = preds[:, 0:1]
    y_clicked = preds[:, 1:2]
    y_unclicked = preds[:, 2:3]
    # TODO(synk): the reference gates each head on `attention_output.sum().item() != 0`
    # (host-side data-dependent control flow); with random weights the sums are
    # nonzero, so all heads are treated as valid here.
    y_avg = jnp.mean(preds, axis=1, keepdims=True)
    return y_ctxt, y_clicked, y_unclicked, y_avg


# ----------------------------- deterministic init -----------------------------

def _linear_init(key, fan_in, fan_out):
    kw, kb = jax.random.split(key)
    bound = 1.0 / jnp.sqrt(fan_in)
    w = jax.random.uniform(kw, (fan_in, fan_out), jnp.float32, -bound, bound)
    b = jax.random.uniform(kb, (fan_out,), jnp.float32, -bound, bound)
    return w, b


def init_params(key, *, n_ft, k, num_aux_type, total_embed_dim, att_hidden_dim):
    keys = jax.random.split(key, 16)
    emb = jax.random.normal(keys[0], (n_ft + 1, k), jnp.float32)

    wp, bp, wa, ba = [], [], [], []
    for i in range(num_aux_type):
        w, b = _linear_init(keys[1 + i], total_embed_dim, att_hidden_dim)
        wp.append(w); bp.append(b)
        w, b = _linear_init(keys[4 + i], att_hidden_dim, att_hidden_dim)
        wa.append(w); ba.append(b)
    wp = jnp.stack(wp); bp = jnp.stack(bp)
    wa = jnp.stack(wa); ba = jnp.stack(ba)

    ln_g = jnp.ones((1, att_hidden_dim), jnp.float32)
    ln_b = jnp.zeros((1, att_hidden_dim), jnp.float32)

    # three prediction MLPs (context / clicked / unclicked), stacked on axis 0
    w1s, b1s, w2s, b2s, w3s, b3s = [], [], [], [], [], []
    for i in range(3):
        w, b = _linear_init(keys[7 + i], att_hidden_dim, 256); w1s.append(w); b1s.append(b)
        w, b = _linear_init(keys[10 + i], 256, 128);           w2s.append(w); b2s.append(b)
        w, b = _linear_init(keys[13 + i], 128, 1);             w3s.append(w); b3s.append(b)
    mlp = {
        "w1": jnp.stack(w1s), "b1": jnp.stack(b1s),
        "g1": jnp.ones((3, 256), jnp.float32), "be1": jnp.zeros((3, 256), jnp.float32),
        "rm1": jnp.zeros((3, 256), jnp.float32), "rv1": jnp.ones((3, 256), jnp.float32),
        "w2": jnp.stack(w2s), "b2": jnp.stack(b2s),
        "g2": jnp.ones((3, 128), jnp.float32), "be2": jnp.zeros((3, 128), jnp.float32),
        "rm2": jnp.zeros((3, 128), jnp.float32), "rv2": jnp.ones((3, 128), jnp.float32),
        "w3": jnp.stack(w3s), "b3": jnp.stack(b3s),
    }
    return {"emb": emb, "wp": wp, "bp": bp, "wa": wa, "ba": ba,
            "ln_g": ln_g, "ln_b": ln_b, "mlp": mlp}


# ----------------------------- main -----------------------------

if __name__ == "__main__":
    # model hyper-params (small, consistent with the module)
    num_aux_type = 3
    n_one_hot_slot = 4
    n_mul_hot_slot = 2
    m_per_slot = 3                      # multi-hot values per slot
    max_num_aux_inst = 4                # same for all aux types so they stack on T
    k = 8
    att_hidden_dim = 32
    n_ft = 100
    temperature = 1.5
    total_embed_dim = (n_one_hot_slot + n_mul_hot_slot) * k   # 48
    B = 8

    root = jax.random.PRNGKey(0)
    k_param, k_in = jax.random.split(root)
    params = init_params(k_param, n_ft=n_ft, k=k, num_aux_type=num_aux_type,
                         total_embed_dim=total_embed_dim,
                         att_hidden_dim=att_hidden_dim)

    ks = jax.random.split(k_in, 4)
    x_one = jax.random.randint(ks[0], (B, n_one_hot_slot), 0, n_ft + 1)
    x_mul = jax.random.randint(ks[1], (B, n_mul_hot_slot, m_per_slot), 0, n_ft + 1)
    x_one_aux = jax.random.randint(
        ks[2], (num_aux_type, B, max_num_aux_inst, n_one_hot_slot), 0, n_ft + 1)
    x_mul_aux = jax.random.randint(
        ks[3], (num_aux_type, B, max_num_aux_inst, n_mul_hot_slot, m_per_slot), 0, n_ft + 1)

    fwd = jax.jit(functools.partial(forward, temperature=temperature))
    y_ctxt, y_clicked, y_unclicked, y_avg = fwd(params, x_one, x_mul,
                                                x_one_aux, x_mul_aux)
    jax.block_until_ready((y_ctxt, y_clicked, y_unclicked, y_avg))

    assert y_ctxt.shape == (B, 1) and y_clicked.shape == (B, 1)
    assert y_unclicked.shape == (B, 1) and y_avg.shape == (B, 1)
    assert bool(jnp.all(jnp.isfinite(y_avg)))
    print("KERNEL_OK")
</pallas_src>

<mosaic_0001>
module attributes {stable_mosaic.version = 11 : i64} {
  func.func @_fused_kernel(%arg0: i32, %arg1: memref<3x40x48xbf16, #tpu.memory_space<vmem>>, %arg2: memref<3x48x32xbf16, #tpu.memory_space<vmem>>, %arg3: memref<3x32x256xbf16, #tpu.memory_space<vmem>>, %arg4: memref<3x256x128xbf16, #tpu.memory_space<vmem>>, %arg5: memref<3x40x256xf32, #tpu.memory_space<vmem>>, %arg6: memref<8x3xf32, #tpu.memory_space<vmem>>) attributes {dimension_semantics = [#tpu.dimension_semantics<arbitrary>], iteration_bounds = array<i64: 1>, scalar_prefetch = 0 : i64, scratch_operands = 0 : i64, tpu.core_type = #tpu.core_type<tc>, window_params = [{pipeline_mode = #tpu.pipeline_mode<synchronous>, transform_indices = @transform_0, window_bounds = array<i64: 3, 40, 48>}, {pipeline_mode = #tpu.pipeline_mode<synchronous>, transform_indices = @transform_1, window_bounds = array<i64: 3, 48, 32>}, {pipeline_mode = #tpu.pipeline_mode<synchronous>, transform_indices = @transform_2, window_bounds = array<i64: 3, 32, 256>}, {pipeline_mode = #tpu.pipeline_mode<synchronous>, transform_indices = @transform_3, window_bounds = array<i64: 3, 256, 128>}, {pipeline_mode = #tpu.pipeline_mode<synchronous>, transform_indices = @transform_4, window_bounds = array<i64: 3, 40, 256>}, {pipeline_mode = #tpu.pipeline_mode<synchronous>, transform_indices = @transform_5, window_bounds = array<i64: 8, 3>}]} {
    %c0 = arith.constant 0 : index
    %c0_0 = arith.constant 0 : index
    %c0_1 = arith.constant 0 : index
    %0 = vector.load %arg1[%c0, %c0_0, %c0_1] : memref<3x40x48xbf16, #tpu.memory_space<vmem>>, vector<1x40x48xbf16>
    %1 = vector.shape_cast %0 : vector<1x40x48xbf16> to vector<40x48xbf16>
    %c0_2 = arith.constant 0 : index
    %c0_3 = arith.constant 0 : index
    %c0_4 = arith.constant 0 : index
    %2 = vector.load %arg2[%c0_2, %c0_3, %c0_4] : memref<3x48x32xbf16, #tpu.memory_space<vmem>>, vector<1x48x32xbf16>
    %3 = vector.shape_cast %2 : vector<1x48x32xbf16> to vector<48x32xbf16>
    %c0_5 = arith.constant 0 : index
    %c0_6 = arith.constant 0 : index
    %c0_7 = arith.constant 0 : index
    %4 = vector.load %arg5[%c0_5, %c0_6, %c0_7] : memref<3x40x256xf32, #tpu.memory_space<vmem>>, vector<1x1x32xf32>
    %5 = vector.shape_cast %4 : vector<1x1x32xf32> to vector<1x32xf32>
    %c0_8 = arith.constant 0 : index
    %c1 = arith.constant 1 : index
    %c0_9 = arith.constant 0 : index
    %6 = vector.load %arg5[%c0_8, %c1, %c0_9] : memref<3x40x256xf32, #tpu.memory_space<vmem>>, vector<1x1x32xf32>
    %7 = vector.shape_cast %6 : vector<1x1x32xf32> to vector<1x32xf32>
    %c0_10 = arith.constant 0 : index
    %c2 = arith.constant 2 : index
    %c0_11 = arith.constant 0 : index
    %8 = vector.load %arg5[%c0_10, %c2, %c0_11] : memref<3x40x256xf32, #tpu.memory_space<vmem>>, vector<1x1x32xf32>
    %9 = vector.shape_cast %8 : vector<1x1x32xf32> to vector<1x32xf32>
    %c0_12 = arith.constant 0 : index
    %c3 = arith.constant 3 : index
    %c0_13 = arith.constant 0 : index
    %10 = vector.load %arg5[%c0_12, %c3, %c0_13] : memref<3x40x256xf32, #tpu.memory_space<vmem>>, vector<1x1x256xf32>
    %11 = vector.shape_cast %10 : vector<1x1x256xf32> to vector<1x256xf32>
    %c0_14 = arith.constant 0 : index
    %c4 = arith.constant 4 : index
    %c0_15 = arith.constant 0 : index
    %12 = vector.load %arg5[%c0_14, %c4, %c0_15] : memref<3x40x256xf32, #tpu.memory_space<vmem>>, vector<1x1x128xf32>
    %13 = vector.shape_cast %12 : vector<1x1x128xf32> to vector<1x128xf32>
    %c0_16 = arith.constant 0 : index
    %c5 = arith.constant 5 : index
    %c0_17 = arith.constant 0 : index
    %14 = vector.load %arg5[%c0_16, %c5, %c0_17] : memref<3x40x256xf32, #tpu.memory_space<vmem>>, vector<1x1x128xf32>
    %15 = vector.shape_cast %14 : vector<1x1x128xf32> to vector<1x128xf32>
    %c0_18 = arith.constant 0 : index
    %c6 = arith.constant 6 : index
    %c0_19 = arith.constant 0 : index
    %16 = vector.load %arg5[%c0_18, %c6, %c0_19] : memref<3x40x256xf32, #tpu.memory_space<vmem>>, vector<1x1x1xf32>
    %17 = vector.shape_cast %16 : vector<1x1x1xf32> to vector<1x1xf32>
    %c0_20 = arith.constant 0 : index
    %c8 = arith.constant 8 : index
    %c0_21 = arith.constant 0 : index
    %18 = vector.load %arg5[%c0_20, %c8, %c0_21] : memref<3x40x256xf32, #tpu.memory_space<vmem>>, vector<1x32x1xf32>
    %19 = vector.shape_cast %18 : vector<1x32x1xf32> to vector<32x1xf32>
    %cst = arith.constant dense<0.000000e+00> : vector<40x32xf32>
    %20 = tpu.matmul %1, %3, %cst {dimension_numbers = #tpu.dot_dimension_numbers<[1], [0], [0], [1], [0, 0, 1, 1], [], []>} : vector<40x48xbf16>, vector<48x32xbf16>, vector<40x32xf32> -> vector<40x32xf32>
    %21 = vector.broadcast %5 : vector<1x32xf32> to vector<40x32xf32>
    %22 = arith.addf %20, %21 : vector<40x32xf32>
    %23 = vector.extract_strided_slice %22 {offsets = [0, 0], sizes = [32, 32], strides = [1, 1]} : vector<40x32xf32> to vector<32x32xf32>
    %24 = vector.extract_strided_slice %22 {offsets = [32, 0], sizes = [8, 32], strides = [1, 1]} : vector<40x32xf32> to vector<8x32xf32>
    %25 = tpu.concatenate %24, %24, %24, %24 in 0 : vector<8x32xf32>, vector<8x32xf32>, vector<8x32xf32>, vector<8x32xf32> -> vector<32x32xf32>
    %26 = arith.mulf %23, %25 : vector<32x32xf32>
    %cst_22 = arith.constant dense<0.000000e+00> : vector<32xf32>
    %27 = vector.multi_reduction <add>, %26, %cst_22 [1] : vector<32x32xf32> to vector<32xf32>
    %28 = vector.shape_cast %27 : vector<32xf32> to vector<32x1xf32>
    %cst_23 = arith.constant 0.666666686 : f32
    %29 = vector.broadcast %cst_23 : f32 to vector<32x1xf32>
    %30 = arith.mulf %28, %29 : vector<32x1xf32>
    %31 = arith.addf %30, %19 : vector<32x1xf32>
    %32 = vector.extract_strided_slice %31 {offsets = [0, 0], sizes = [8, 1], strides = [1, 1]} : vector<32x1xf32> to vector<8x1xf32>
    %33 = vector.extract_strided_slice %31 {offsets = [8, 0], sizes = [8, 1], strides = [1, 1]} : vector<32x1xf32> to vector<8x1xf32>
    %34 = arith.maximumf %32, %33 : vector<8x1xf32>
    %35 = vector.extract_strided_slice %31 {offsets = [16, 0], sizes = [8, 1], strides = [1, 1]} : vector<32x1xf32> to vector<8x1xf32>
    %36 = arith.maximumf %34, %35 : vector<8x1xf32>
    %37 = vector.extract_strided_slice %31 {offsets = [24, 0], sizes = [8, 1], strides = [1, 1]} : vector<32x1xf32> to vector<8x1xf32>
    %38 = arith.maximumf %36, %37 : vector<8x1xf32>
    %39 = tpu.concatenate %38, %38, %38, %38 in 0 : vector<8x1xf32>, vector<8x1xf32>, vector<8x1xf32>, vector<8x1xf32> -> vector<32x1xf32>
    %40 = arith.subf %31, %39 : vector<32x1xf32>
    %41 = math.exp %40 : vector<32x1xf32>
    %42 = vector.extract_strided_slice %41 {offsets = [0, 0], sizes = [8, 1], strides = [1, 1]} : vector<32x1xf32> to vector<8x1xf32>
    %43 = vector.extract_strided_slice %41 {offsets = [8, 0], sizes = [8, 1], strides = [1, 1]} : vector<32x1xf32> to vector<8x1xf32>
    %44 = arith.addf %42, %43 : vector<8x1xf32>
    %45 = vector.extract_strided_slice %41 {offsets = [16, 0], sizes = [8, 1], strides = [1, 1]} : vector<32x1xf32> to vector<8x1xf32>
    %46 = arith.addf %44, %45 : vector<8x1xf32>
    %47 = vector.extract_strided_slice %41 {offsets = [24, 0], sizes = [8, 1], strides = [1, 1]} : vector<32x1xf32> to vector<8x1xf32>
    %48 = arith.addf %46, %47 : vector<8x1xf32>
    %49 = tpu.reciprocal %48 {approx = true} : vector<8x1xf32> -> vector<8x1xf32>
    %50 = tpu.concatenate %49, %49, %49, %49 in 0 : vector<8x1xf32>, vector<8x1xf32>, vector<8x1xf32>, vector<8x1xf32> -> vector<32x1xf32>
    %51 = arith.mulf %41, %50 : vector<32x1xf32>
    %52 = vector.broadcast %51 : vector<32x1xf32> to vector<32x32xf32>
    %53 = arith.mulf %52, %23 : vector<32x32xf32>
    %54 = vector.extract_strided_slice %53 {offsets = [0, 0], sizes = [8, 32], strides = [1, 1]} : vector<32x32xf32> to vector<8x32xf32>
    %55 = vector.extract_strided_slice %53 {offsets = [8, 0], sizes = [8, 32], strides = [1, 1]} : vector<32x32xf32> to vector<8x32xf32>
    %56 = arith.addf %54, %55 : vector<8x32xf32>
    %57 = vector.extract_strided_slice %53 {offsets = [16, 0], sizes = [8, 32], strides = [1, 1]} : vector<32x32xf32> to vector<8x32xf32>
    %58 = arith.addf %56, %57 : vector<8x32xf32>
    %59 = vector.extract_strided_slice %53 {offsets = [24, 0], sizes = [8, 32], strides = [1, 1]} : vector<32x32xf32> to vector<8x32xf32>
    %60 = arith.addf %58, %59 : vector<8x32xf32>
    %cst_24 = arith.constant dense<0.000000e+00> : vector<8xf32>
    %61 = vector.multi_reduction <add>, %60, %cst_24 [1] : vector<8x32xf32> to vector<8xf32>
    %62 = vector.shape_cast %61 : vector<8xf32> to vector<8x1xf32>
    %cst_25 = arith.constant 3.200000e+01 : f32
    %63 = vector.broadcast %cst_25 : f32 to vector<8x1xf32>
    %64 = arith.divf %62, %63 : vector<8x1xf32>
    %65 = vector.broadcast %64 : vector<8x1xf32> to vector<8x32xf32>
    %66 = arith.subf %60, %65 : vector<8x32xf32>
    %67 = arith.mulf %66, %66 : vector<8x32xf32>
    %cst_26 = arith.constant dense<0.000000e+00> : vector<8xf32>
    %68 = vector.multi_reduction <add>, %67, %cst_26 [1] : vector<8x32xf32> to vector<8xf32>
    %69 = vector.shape_cast %68 : vector<8xf32> to vector<8x1xf32>
    %cst_27 = arith.constant 3.200000e+01 : f32
    %70 = vector.broadcast %cst_27 : f32 to vector<8x1xf32>
    %71 = arith.divf %69, %70 : vector<8x1xf32>
    %cst_28 = arith.constant 9.99999974E-6 : f32
    %72 = vector.broadcast %cst_28 : f32 to vector<8x1xf32>
    %73 = arith.addf %71, %72 : vector<8x1xf32>
    %74 = math.rsqrt %73 : vector<8x1xf32>
    %75 = vector.broadcast %74 : vector<8x1xf32> to vector<8x32xf32>
    %76 = arith.mulf %66, %75 : vector<8x32xf32>
    %77 = vector.broadcast %7 : vector<1x32xf32> to vector<8x32xf32>
    %78 = arith.mulf %76, %77 : vector<8x32xf32>
    %79 = vector.broadcast %9 : vector<1x32xf32> to vector<8x32xf32>
    %80 = arith.addf %78, %79 : vector<8x32xf32>
    %81 = arith.truncf %80 : vector<8x32xf32> to vector<8x32xbf16>
    %c0_29 = arith.constant 0 : index
    %c0_30 = arith.constant 0 : index
    %c0_31 = arith.constant 0 : index
    %82 = vector.load %arg3[%c0_29, %c0_30, %c0_31] : memref<3x32x256xbf16, #tpu.memory_space<vmem>>, vector<1x32x256xbf16>
    %83 = vector.shape_cast %82 : vector<1x32x256xbf16> to vector<32x256xbf16>
    %cst_32 = arith.constant dense<0.000000e+00> : vector<8x256xf32>
    %84 = tpu.matmul %81, %83, %cst_32 {dimension_numbers = #tpu.dot_dimension_numbers<[1], [0], [0], [1], [0, 0, 1, 1], [], []>} : vector<8x32xbf16>, vector<32x256xbf16>, vector<8x256xf32> -> vector<8x256xf32>
    %85 = vector.broadcast %11 : vector<1x256xf32> to vector<8x256xf32>
    %86 = arith.addf %84, %85 : vector<8x256xf32>
    %cst_33 = arith.constant 0.000000e+00 : f32
    %87 = vector.broadcast %cst_33 : f32 to vector<8x256xf32>
    %88 = arith.maximumf %86, %87 : vector<8x256xf32>
    %89 = arith.truncf %88 : vector<8x256xf32> to vector<8x256xbf16>
    %c0_34 = arith.constant 0 : index
    %c0_35 = arith.constant 0 : index
    %c0_36 = arith.constant 0 : index
    %90 = vector.load %arg4[%c0_34, %c0_35, %c0_36] : memref<3x256x128xbf16, #tpu.memory_space<vmem>>, vector<1x256x128xbf16>
    %91 = vector.shape_cast %90 : vector<1x256x128xbf16> to vector<256x128xbf16>
    %cst_37 = arith.constant dense<0.000000e+00> : vector<8x128xf32>
    %92 = tpu.matmul %89, %91, %cst_37 {dimension_numbers = #tpu.dot_dimension_numbers<[1], [0], [0], [1], [0, 0, 1, 1], [], []>} : vector<8x256xbf16>, vector<256x128xbf16>, vector<8x128xf32> -> vector<8x128xf32>
    %93 = vector.broadcast %13 : vector<1x128xf32> to vector<8x128xf32>
    %94 = arith.addf %92, %93 : vector<8x128xf32>
    %cst_38 = arith.constant 0.000000e+00 : f32
    %95 = vector.broadcast %cst_38 : f32 to vector<8x128xf32>
    %96 = arith.maximumf %94, %95 : vector<8x128xf32>
    %97 = vector.broadcast %15 : vector<1x128xf32> to vector<8x128xf32>
    %98 = arith.mulf %96, %97 : vector<8x128xf32>
    %cst_39 = arith.constant dense<0.000000e+00> : vector<8xf32>
    %99 = vector.multi_reduction <add>, %98, %cst_39 [1] : vector<8x128xf32> to vector<8xf32>
    %100 = vector.shape_cast %99 : vector<8xf32> to vector<8x1xf32>
    %101 = vector.broadcast %17 : vector<1x1xf32> to vector<8x1xf32>
    %102 = arith.addf %100, %101 : vector<8x1xf32>
    %c1_40 = arith.constant 1 : index
    %c0_41 = arith.constant 0 : index
    %c0_42 = arith.constant 0 : index
    %103 = vector.load %arg1[%c1_40, %c0_41, %c0_42] : memref<3x40x48xbf16, #tpu.memory_space<vmem>>, vector<1x40x48xbf16>
    %104 = vector.shape_cast %103 : vector<1x40x48xbf16> to vector<40x48xbf16>
    %c1_43 = arith.constant 1 : index
    %c0_44 = arith.constant 0 : index
    %c0_45 = arith.constant 0 : index
    %105 = vector.load %arg2[%c1_43, %c0_44, %c0_45] : memref<3x48x32xbf16, #tpu.memory_space<vmem>>, vector<1x48x32xbf16>
    %106 = vector.shape_cast %105 : vector<1x48x32xbf16> to vector<48x32xbf16>
    %c1_46 = arith.constant 1 : index
    %c0_47 = arith.constant 0 : index
    %c0_48 = arith.constant 0 : index
    %107 = vector.load %arg5[%c1_46, %c0_47, %c0_48] : memref<3x40x256xf32, #tpu.memory_space<vmem>>, vector<1x1x32xf32>
    %108 = vector.shape_cast %107 : vector<1x1x32xf32> to vector<1x32xf32>
    %c1_49 = arith.constant 1 : index
    %c1_50 = arith.constant 1 : index
    %c0_51 = arith.constant 0 : index
    %109 = vector.load %arg5[%c1_49, %c1_50, %c0_51] : memref<3x40x256xf32, #tpu.memory_space<vmem>>, vector<1x1x32xf32>
    %110 = vector.shape_cast %109 : vector<1x1x32xf32> to vector<1x32xf32>
    %c1_52 = arith.constant 1 : index
    %c2_53 = arith.constant 2 : index
    %c0_54 = arith.constant 0 : index
    %111 = vector.load %arg5[%c1_52, %c2_53, %c0_54] : memref<3x40x256xf32, #tpu.memory_space<vmem>>, vector<1x1x32xf32>
    %112 = vector.shape_cast %111 : vector<1x1x32xf32> to vector<1x32xf32>
    %c1_55 = arith.constant 1 : index
    %c3_56 = arith.constant 3 : index
    %c0_57 = arith.constant 0 : index
    %113 = vector.load %arg5[%c1_55, %c3_56, %c0_57] : memref<3x40x256xf32, #tpu.memory_space<vmem>>, vector<1x1x256xf32>
    %114 = vector.shape_cast %113 : vector<1x1x256xf32> to vector<1x256xf32>
    %c1_58 = arith.constant 1 : index
    %c4_59 = arith.constant 4 : index
    %c0_60 = arith.constant 0 : index
    %115 = vector.load %arg5[%c1_58, %c4_59, %c0_60] : memref<3x40x256xf32, #tpu.memory_space<vmem>>, vector<1x1x128xf32>
    %116 = vector.shape_cast %115 : vector<1x1x128xf32> to vector<1x128xf32>
    %c1_61 = arith.constant 1 : index
    %c5_62 = arith.constant 5 : index
    %c0_63 = arith.constant 0 : index
    %117 = vector.load %arg5[%c1_61, %c5_62, %c0_63] : memref<3x40x256xf32, #tpu.memory_space<vmem>>, vector<1x1x128xf32>
    %118 = vector.shape_cast %117 : vector<1x1x128xf32> to vector<1x128xf32>
    %c1_64 = arith.constant 1 : index
    %c6_65 = arith.constant 6 : index
    %c0_66 = arith.constant 0 : index
    %119 = vector.load %arg5[%c1_64, %c6_65, %c0_66] : memref<3x40x256xf32, #tpu.memory_space<vmem>>, vector<1x1x1xf32>
    %120 = vector.shape_cast %119 : vector<1x1x1xf32> to vector<1x1xf32>
    %c1_67 = arith.constant 1 : index
    %c8_68 = arith.constant 8 : index
    %c0_69 = arith.constant 0 : index
    %121 = vector.load %arg5[%c1_67, %c8_68, %c0_69] : memref<3x40x256xf32, #tpu.memory_space<vmem>>, vector<1x32x1xf32>
    %122 = vector.shape_cast %121 : vector<1x32x1xf32> to vector<32x1xf32>
    %cst_70 = arith.constant dense<0.000000e+00> : vector<40x32xf32>
    %123 = tpu.matmul %104, %106, %cst_70 {dimension_numbers = #tpu.dot_dimension_numbers<[1], [0], [0], [1], [0, 0, 1, 1], [], []>} : vector<40x48xbf16>, vector<48x32xbf16>, vector<40x32xf32> -> vector<40x32xf32>
    %124 = vector.broadcast %108 : vector<1x32xf32> to vector<40x32xf32>
    %125 = arith.addf %123, %124 : vector<40x32xf32>
    %126 = vector.extract_strided_slice %125 {offsets = [0, 0], sizes = [32, 32], strides = [1, 1]} : vector<40x32xf32> to vector<32x32xf32>
    %127 = vector.extract_strided_slice %125 {offsets = [32, 0], sizes = [8, 32], strides = [1, 1]} : vector<40x32xf32> to vector<8x32xf32>
    %128 = tpu.concatenate %127, %127, %127, %127 in 0 : vector<8x32xf32>, vector<8x32xf32>, vector<8x32xf32>, vector<8x32xf32> -> vector<32x32xf32>
    %129 = arith.mulf %126, %128 : vector<32x32xf32>
    %cst_71 = arith.constant dense<0.000000e+00> : vector<32xf32>
    %130 = vector.multi_reduction <add>, %129, %cst_71 [1] : vector<32x32xf32> to vector<32xf32>
    %131 = vector.shape_cast %130 : vector<32xf32> to vector<32x1xf32>
    %cst_72 = arith.constant 0.666666686 : f32
    %132 = vector.broadcast %cst_72 : f32 to vector<32x1xf32>
    %133 = arith.mulf %131, %132 : vector<32x1xf32>
    %134 = arith.addf %133, %122 : vector<32x1xf32>
    %135 = vector.extract_strided_slice %134 {offsets = [0, 0], sizes = [8, 1], strides = [1, 1]} : vector<32x1xf32> to vector<8x1xf32>
    %136 = vector.extract_strided_slice %134 {offsets = [8, 0], sizes = [8, 1], strides = [1, 1]} : vector<32x1xf32> to vector<8x1xf32>
    %137 = arith.maximumf %135, %136 : vector<8x1xf32>
    %138 = vector.extract_strided_slice %134 {offsets = [16, 0], sizes = [8, 1], strides = [1, 1]} : vector<32x1xf32> to vector<8x1xf32>
    %139 = arith.maximumf %137, %138 : vector<8x1xf32>
    %140 = vector.extract_strided_slice %134 {offsets = [24, 0], sizes = [8, 1], strides = [1, 1]} : vector<32x1xf32> to vector<8x1xf32>
    %141 = arith.maximumf %139, %140 : vector<8x1xf32>
    %142 = tpu.concatenate %141, %141, %141, %141 in 0 : vector<8x1xf32>, vector<8x1xf32>, vector<8x1xf32>, vector<8x1xf32> -> vector<32x1xf32>
    %143 = arith.subf %134, %142 : vector<32x1xf32>
    %144 = math.exp %143 : vector<32x1xf32>
    %145 = vector.extract_strided_slice %144 {offsets = [0, 0], sizes = [8, 1], strides = [1, 1]} : vector<32x1xf32> to vector<8x1xf32>
    %146 = vector.extract_strided_slice %144 {offsets = [8, 0], sizes = [8, 1], strides = [1, 1]} : vector<32x1xf32> to vector<8x1xf32>
    %147 = arith.addf %145, %146 : vector<8x1xf32>
    %148 = vector.extract_strided_slice %144 {offsets = [16, 0], sizes = [8, 1], strides = [1, 1]} : vector<32x1xf32> to vector<8x1xf32>
    %149 = arith.addf %147, %148 : vector<8x1xf32>
    %150 = vector.extract_strided_slice %144 {offsets = [24, 0], sizes = [8, 1], strides = [1, 1]} : vector<32x1xf32> to vector<8x1xf32>
    %151 = arith.addf %149, %150 : vector<8x1xf32>
    %152 = tpu.reciprocal %151 {approx = true} : vector<8x1xf32> -> vector<8x1xf32>
    %153 = tpu.concatenate %152, %152, %152, %152 in 0 : vector<8x1xf32>, vector<8x1xf32>, vector<8x1xf32>, vector<8x1xf32> -> vector<32x1xf32>
    %154 = arith.mulf %144, %153 : vector<32x1xf32>
    %155 = vector.broadcast %154 : vector<32x1xf32> to vector<32x32xf32>
    %156 = arith.mulf %155, %126 : vector<32x32xf32>
    %157 = vector.extract_strided_slice %156 {offsets = [0, 0], sizes = [8, 32], strides = [1, 1]} : vector<32x32xf32> to vector<8x32xf32>
    %158 = vector.extract_strided_slice %156 {offsets = [8, 0], sizes = [8, 32], strides = [1, 1]} : vector<32x32xf32> to vector<8x32xf32>
    %159 = arith.addf %157, %158 : vector<8x32xf32>
    %160 = vector.extract_strided_slice %156 {offsets = [16, 0], sizes = [8, 32], strides = [1, 1]} : vector<32x32xf32> to vector<8x32xf32>
    %161 = arith.addf %159, %160 : vector<8x32xf32>
    %162 = vector.extract_strided_slice %156 {offsets = [24, 0], sizes = [8, 32], strides = [1, 1]} : vector<32x32xf32> to vector<8x32xf32>
    %163 = arith.addf %161, %162 : vector<8x32xf32>
    %cst_73 = arith.constant dense<0.000000e+00> : vector<8xf32>
    %164 = vector.multi_reduction <add>, %163, %cst_73 [1] : vector<8x32xf32> to vector<8xf32>
    %165 = vector.shape_cast %164 : vector<8xf32> to vector<8x1xf32>
    %cst_74 = arith.constant 3.200000e+01 : f32
    %166 = vector.broadcast %cst_74 : f32 to vector<8x1xf32>
    %167 = arith.divf %165, %166 : vector<8x1xf32>
    %168 = vector.broadcast %167 : vector<8x1xf32> to vector<8x32xf32>
    %169 = arith.subf %163, %168 : vector<8x32xf32>
    %170 = arith.mulf %169, %169 : vector<8x32xf32>
    %cst_75 = arith.constant dense<0.000000e+00> : vector<8xf32>
    %171 = vector.multi_reduction <add>, %170, %cst_75 [1] : vector<8x32xf32> to vector<8xf32>
    %172 = vector.shape_cast %171 : vector<8xf32> to vector<8x1xf32>
    %cst_76 = arith.constant 3.200000e+01 : f32
    %173 = vector.broadcast %cst_76 : f32 to vector<8x1xf32>
    %174 = arith.divf %172, %173 : vector<8x1xf32>
    %cst_77 = arith.constant 9.99999974E-6 : f32
    %175 = vector.broadcast %cst_77 : f32 to vector<8x1xf32>
    %176 = arith.addf %174, %175 : vector<8x1xf32>
    %177 = math.rsqrt %176 : vector<8x1xf32>
    %178 = vector.broadcast %177 : vector<8x1xf32> to vector<8x32xf32>
    %179 = arith.mulf %169, %178 : vector<8x32xf32>
    %180 = vector.broadcast %110 : vector<1x32xf32> to vector<8x32xf32>
    %181 = arith.mulf %179, %180 : vector<8x32xf32>
    %182 = vector.broadcast %112 : vector<1x32xf32> to vector<8x32xf32>
    %183 = arith.addf %181, %182 : vector<8x32xf32>
    %184 = arith.truncf %183 : vector<8x32xf32> to vector<8x32xbf16>
    %c1_78 = arith.constant 1 : index
    %c0_79 = arith.constant 0 : index
    %c0_80 = arith.constant 0 : index
    %185 = vector.load %arg3[%c1_78, %c0_79, %c0_80] : memref<3x32x256xbf16, #tpu.memory_space<vmem>>, vector<1x32x256xbf16>
    %186 = vector.shape_cast %185 : vector<1x32x256xbf16> to vector<32x256xbf16>
    %cst_81 = arith.constant dense<0.000000e+00> : vector<8x256xf32>
    %187 = tpu.matmul %184, %186, %cst_81 {dimension_numbers = #tpu.dot_dimension_numbers<[1], [0], [0], [1], [0, 0, 1, 1], [], []>} : vector<8x32xbf16>, vector<32x256xbf16>, vector<8x256xf32> -> vector<8x256xf32>
    %188 = vector.broadcast %114 : vector<1x256xf32> to vector<8x256xf32>
    %189 = arith.addf %187, %188 : vector<8x256xf32>
    %cst_82 = arith.constant 0.000000e+00 : f32
    %190 = vector.broadcast %cst_82 : f32 to vector<8x256xf32>
    %191 = arith.maximumf %189, %190 : vector<8x256xf32>
    %192 = arith.truncf %191 : vector<8x256xf32> to vector<8x256xbf16>
    %c1_83 = arith.constant 1 : index
    %c0_84 = arith.constant 0 : index
    %c0_85 = arith.constant 0 : index
    %193 = vector.load %arg4[%c1_83, %c0_84, %c0_85] : memref<3x256x128xbf16, #tpu.memory_space<vmem>>, vector<1x256x128xbf16>
    %194 = vector.shape_cast %193 : vector<1x256x128xbf16> to vector<256x128xbf16>
    %cst_86 = arith.constant dense<0.000000e+00> : vector<8x128xf32>
    %195 = tpu.matmul %192, %194, %cst_86 {dimension_numbers = #tpu.dot_dimension_numbers<[1], [0], [0], [1], [0, 0, 1, 1], [], []>} : vector<8x256xbf16>, vector<256x128xbf16>, vector<8x128xf32> -> vector<8x128xf32>
    %196 = vector.broadcast %116 : vector<1x128xf32> to vector<8x128xf32>
    %197 = arith.addf %195, %196 : vector<8x128xf32>
    %cst_87 = arith.constant 0.000000e+00 : f32
    %198 = vector.broadcast %cst_87 : f32 to vector<8x128xf32>
    %199 = arith.maximumf %197, %198 : vector<8x128xf32>
    %200 = vector.broadcast %118 : vector<1x128xf32> to vector<8x128xf32>
    %201 = arith.mulf %199, %200 : vector<8x128xf32>
    %cst_88 = arith.constant dense<0.000000e+00> : vector<8xf32>
    %202 = vector.multi_reduction <add>, %201, %cst_88 [1] : vector<8x128xf32> to vector<8xf32>
    %203 = vector.shape_cast %202 : vector<8xf32> to vector<8x1xf32>
    %204 = vector.broadcast %120 : vector<1x1xf32> to vector<8x1xf32>
    %205 = arith.addf %203, %204 : vector<8x1xf32>
    %c2_89 = arith.constant 2 : index
    %c0_90 = arith.constant 0 : index
    %c0_91 = arith.constant 0 : index
    %206 = vector.load %arg1[%c2_89, %c0_90, %c0_91] : memref<3x40x48xbf16, #tpu.memory_space<vmem>>, vector<1x40x48xbf16>
    %207 = vector.shape_cast %206 : vector<1x40x48xbf16> to vector<40x48xbf16>
    %c2_92 = arith.constant 2 : index
    %c0_93 = arith.constant 0 : index
    %c0_94 = arith.constant 0 : index
    %208 = vector.load %arg2[%c2_92, %c0_93, %c0_94] : memref<3x48x32xbf16, #tpu.memory_space<vmem>>, vector<1x48x32xbf16>
    %209 = vector.shape_cast %208 : vector<1x48x32xbf16> to vector<48x32xbf16>
    %c2_95 = arith.constant 2 : index
    %c0_96 = arith.constant 0 : index
    %c0_97 = arith.constant 0 : index
    %210 = vector.load %arg5[%c2_95, %c0_96, %c0_97] : memref<3x40x256xf32, #tpu.memory_space<vmem>>, vector<1x1x32xf32>
    %211 = vector.shape_cast %210 : vector<1x1x32xf32> to vector<1x32xf32>
    %c2_98 = arith.constant 2 : index
    %c1_99 = arith.constant 1 : index
    %c0_100 = arith.constant 0 : index
    %212 = vector.load %arg5[%c2_98, %c1_99, %c0_100] : memref<3x40x256xf32, #tpu.memory_space<vmem>>, vector<1x1x32xf32>
    %213 = vector.shape_cast %212 : vector<1x1x32xf32> to vector<1x32xf32>
    %c2_101 = arith.constant 2 : index
    %c2_102 = arith.constant 2 : index
    %c0_103 = arith.constant 0 : index
    %214 = vector.load %arg5[%c2_101, %c2_102, %c0_103] : memref<3x40x256xf32, #tpu.memory_space<vmem>>, vector<1x1x32xf32>
    %215 = vector.shape_cast %214 : vector<1x1x32xf32> to vector<1x32xf32>
    %c2_104 = arith.constant 2 : index
    %c3_105 = arith.constant 3 : index
    %c0_106 = arith.constant 0 : index
    %216 = vector.load %arg5[%c2_104, %c3_105, %c0_106] : memref<3x40x256xf32, #tpu.memory_space<vmem>>, vector<1x1x256xf32>
    %217 = vector.shape_cast %216 : vector<1x1x256xf32> to vector<1x256xf32>
    %c2_107 = arith.constant 2 : index
    %c4_108 = arith.constant 4 : index
    %c0_109 = arith.constant 0 : index
    %218 = vector.load %arg5[%c2_107, %c4_108, %c0_109] : memref<3x40x256xf32, #tpu.memory_space<vmem>>, vector<1x1x128xf32>
    %219 = vector.shape_cast %218 : vector<1x1x128xf32> to vector<1x128xf32>
    %c2_110 = arith.constant 2 : index
    %c5_111 = arith.constant 5 : index
    %c0_112 = arith.constant 0 : index
    %220 = vector.load %arg5[%c2_110, %c5_111, %c0_112] : memref<3x40x256xf32, #tpu.memory_space<vmem>>, vector<1x1x128xf32>
    %221 = vector.shape_cast %220 : vector<1x1x128xf32> to vector<1x128xf32>
    %c2_113 = arith.constant 2 : index
    %c6_114 = arith.constant 6 : index
    %c0_115 = arith.constant 0 : index
    %222 = vector.load %arg5[%c2_113, %c6_114, %c0_115] : memref<3x40x256xf32, #tpu.memory_space<vmem>>, vector<1x1x1xf32>
    %223 = vector.shape_cast %222 : vector<1x1x1xf32> to vector<1x1xf32>
    %c2_116 = arith.constant 2 : index
    %c8_117 = arith.constant 8 : index
    %c0_118 = arith.constant 0 : index
    %224 = vector.load %arg5[%c2_116, %c8_117, %c0_118] : memref<3x40x256xf32, #tpu.memory_space<vmem>>, vector<1x32x1xf32>
    %225 = vector.shape_cast %224 : vector<1x32x1xf32> to vector<32x1xf32>
    %cst_119 = arith.constant dense<0.000000e+00> : vector<40x32xf32>
    %226 = tpu.matmul %207, %209, %cst_119 {dimension_numbers = #tpu.dot_dimension_numbers<[1], [0], [0], [1], [0, 0, 1, 1], [], []>} : vector<40x48xbf16>, vector<48x32xbf16>, vector<40x32xf32> -> vector<40x32xf32>
    %227 = vector.broadcast %211 : vector<1x32xf32> to vector<40x32xf32>
    %228 = arith.addf %226, %227 : vector<40x32xf32>
    %229 = vector.extract_strided_slice %228 {offsets = [0, 0], sizes = [32, 32], strides = [1, 1]} : vector<40x32xf32> to vector<32x32xf32>
    %230 = vector.extract_strided_slice %228 {offsets = [32, 0], sizes = [8, 32], strides = [1, 1]} : vector<40x32xf32> to vector<8x32xf32>
    %231 = tpu.concatenate %230, %230, %230, %230 in 0 : vector<8x32xf32>, vector<8x32xf32>, vector<8x32xf32>, vector<8x32xf32> -> vector<32x32xf32>
    %232 = arith.mulf %229, %231 : vector<32x32xf32>
    %cst_120 = arith.constant dense<0.000000e+00> : vector<32xf32>
    %233 = vector.multi_reduction <add>, %232, %cst_120 [1] : vector<32x32xf32> to vector<32xf32>
    %234 = vector.shape_cast %233 : vector<32xf32> to vector<32x1xf32>
    %cst_121 = arith.constant 0.666666686 : f32
    %235 = vector.broadcast %cst_121 : f32 to vector<32x1xf32>
    %236 = arith.mulf %234, %235 : vector<32x1xf32>
    %237 = arith.addf %236, %225 : vector<32x1xf32>
    %238 = vector.extract_strided_slice %237 {offsets = [0, 0], sizes = [8, 1], strides = [1, 1]} : vector<32x1xf32> to vector<8x1xf32>
    %239 = vector.extract_strided_slice %237 {offsets = [8, 0], sizes = [8, 1], strides = [1, 1]} : vector<32x1xf32> to vector<8x1xf32>
    %240 = arith.maximumf %238, %239 : vector<8x1xf32>
    %241 = vector.extract_strided_slice %237 {offsets = [16, 0], sizes = [8, 1], strides = [1, 1]} : vector<32x1xf32> to vector<8x1xf32>
    %242 = arith.maximumf %240, %241 : vector<8x1xf32>
    %243 = vector.extract_strided_slice %237 {offsets = [24, 0], sizes = [8, 1], strides = [1, 1]} : vector<32x1xf32> to vector<8x1xf32>
    %244 = arith.maximumf %242, %243 : vector<8x1xf32>
    %245 = tpu.concatenate %244, %244, %244, %244 in 0 : vector<8x1xf32>, vector<8x1xf32>, vector<8x1xf32>, vector<8x1xf32> -> vector<32x1xf32>
    %246 = arith.subf %237, %245 : vector<32x1xf32>
    %247 = math.exp %246 : vector<32x1xf32>
    %248 = vector.extract_strided_slice %247 {offsets = [0, 0], sizes = [8, 1], strides = [1, 1]} : vector<32x1xf32> to vector<8x1xf32>
    %249 = vector.extract_strided_slice %247 {offsets = [8, 0], sizes = [8, 1], strides = [1, 1]} : vector<32x1xf32> to vector<8x1xf32>
    %250 = arith.addf %248, %249 : vector<8x1xf32>
    %251 = vector.extract_strided_slice %247 {offsets = [16, 0], sizes = [8, 1], strides = [1, 1]} : vector<32x1xf32> to vector<8x1xf32>
    %252 = arith.addf %250, %251 : vector<8x1xf32>
    %253 = vector.extract_strided_slice %247 {offsets = [24, 0], sizes = [8, 1], strides = [1, 1]} : vector<32x1xf32> to vector<8x1xf32>
    %254 = arith.addf %252, %253 : vector<8x1xf32>
    %255 = tpu.reciprocal %254 {approx = true} : vector<8x1xf32> -> vector<8x1xf32>
    %256 = tpu.concatenate %255, %255, %255, %255 in 0 : vector<8x1xf32>, vector<8x1xf32>, vector<8x1xf32>, vector<8x1xf32> -> vector<32x1xf32>
    %257 = arith.mulf %247, %256 : vector<32x1xf32>
    %258 = vector.broadcast %257 : vector<32x1xf32> to vector<32x32xf32>
    %259 = arith.mulf %258, %229 : vector<32x32xf32>
    %260 = vector.extract_strided_slice %259 {offsets = [0, 0], sizes = [8, 32], strides = [1, 1]} : vector<32x32xf32> to vector<8x32xf32>
    %261 = vector.extract_strided_slice %259 {offsets = [8, 0], sizes = [8, 32], strides = [1, 1]} : vector<32x32xf32> to vector<8x32xf32>
    %262 = arith.addf %260, %261 : vector<8x32xf32>
    %263 = vector.extract_strided_slice %259 {offsets = [16, 0], sizes = [8, 32], strides = [1, 1]} : vector<32x32xf32> to vector<8x32xf32>
    %264 = arith.addf %262, %263 : vector<8x32xf32>
    %265 = vector.extract_strided_slice %259 {offsets = [24, 0], sizes = [8, 32], strides = [1, 1]} : vector<32x32xf32> to vector<8x32xf32>
    %266 = arith.addf %264, %265 : vector<8x32xf32>
    %cst_122 = arith.constant dense<0.000000e+00> : vector<8xf32>
    %267 = vector.multi_reduction <add>, %266, %cst_122 [1] : vector<8x32xf32> to vector<8xf32>
    %268 = vector.shape_cast %267 : vector<8xf32> to vector<8x1xf32>
    %cst_123 = arith.constant 3.200000e+01 : f32
    %269 = vector.broadcast %cst_123 : f32 to vector<8x1xf32>
    %270 = arith.divf %268, %269 : vector<8x1xf32>
    %271 = vector.broadcast %270 : vector<8x1xf32> to vector<8x32xf32>
    %272 = arith.subf %266, %271 : vector<8x32xf32>
    %273 = arith.mulf %272, %272 : vector<8x32xf32>
    %cst_124 = arith.constant dense<0.000000e+00> : vector<8xf32>
    %274 = vector.multi_reduction <add>, %273, %cst_124 [1] : vector<8x32xf32> to vector<8xf32>
    %275 = vector.shape_cast %274 : vector<8xf32> to vector<8x1xf32>
    %cst_125 = arith.constant 3.200000e+01 : f32
    %276 = vector.broadcast %cst_125 : f32 to vector<8x1xf32>
    %277 = arith.divf %275, %276 : vector<8x1xf32>
    %cst_126 = arith.constant 9.99999974E-6 : f32
    %278 = vector.broadcast %cst_126 : f32 to vector<8x1xf32>
    %279 = arith.addf %277, %278 : vector<8x1xf32>
    %280 = math.rsqrt %279 : vector<8x1xf32>
    %281 = vector.broadcast %280 : vector<8x1xf32> to vector<8x32xf32>
    %282 = arith.mulf %272, %281 : vector<8x32xf32>
    %283 = vector.broadcast %213 : vector<1x32xf32> to vector<8x32xf32>
    %284 = arith.mulf %282, %283 : vector<8x32xf32>
    %285 = vector.broadcast %215 : vector<1x32xf32> to vector<8x32xf32>
    %286 = arith.addf %284, %285 : vector<8x32xf32>
    %287 = arith.truncf %286 : vector<8x32xf32> to vector<8x32xbf16>
    %c2_127 = arith.constant 2 : index
    %c0_128 = arith.constant 0 : index
    %c0_129 = arith.constant 0 : index
    %288 = vector.load %arg3[%c2_127, %c0_128, %c0_129] : memref<3x32x256xbf16, #tpu.memory_space<vmem>>, vector<1x32x256xbf16>
    %289 = vector.shape_cast %288 : vector<1x32x256xbf16> to vector<32x256xbf16>
    %cst_130 = arith.constant dense<0.000000e+00> : vector<8x256xf32>
    %290 = tpu.matmul %287, %289, %cst_130 {dimension_numbers = #tpu.dot_dimension_numbers<[1], [0], [0], [1], [0, 0, 1, 1], [], []>} : vector<8x32xbf16>, vector<32x256xbf16>, vector<8x256xf32> -> vector<8x256xf32>
    %291 = vector.broadcast %217 : vector<1x256xf32> to vector<8x256xf32>
    %292 = arith.addf %290, %291 : vector<8x256xf32>
    %cst_131 = arith.constant 0.000000e+00 : f32
    %293 = vector.broadcast %cst_131 : f32 to vector<8x256xf32>
    %294 = arith.maximumf %292, %293 : vector<8x256xf32>
    %295 = arith.truncf %294 : vector<8x256xf32> to vector<8x256xbf16>
    %c2_132 = arith.constant 2 : index
    %c0_133 = arith.constant 0 : index
    %c0_134 = arith.constant 0 : index
    %296 = vector.load %arg4[%c2_132, %c0_133, %c0_134] : memref<3x256x128xbf16, #tpu.memory_space<vmem>>, vector<1x256x128xbf16>
    %297 = vector.shape_cast %296 : vector<1x256x128xbf16> to vector<256x128xbf16>
    %cst_135 = arith.constant dense<0.000000e+00> : vector<8x128xf32>
    %298 = tpu.matmul %295, %297, %cst_135 {dimension_numbers = #tpu.dot_dimension_numbers<[1], [0], [0], [1], [0, 0, 1, 1], [], []>} : vector<8x256xbf16>, vector<256x128xbf16>, vector<8x128xf32> -> vector<8x128xf32>
    %299 = vector.broadcast %219 : vector<1x128xf32> to vector<8x128xf32>
    %300 = arith.addf %298, %299 : vector<8x128xf32>
    %cst_136 = arith.constant 0.000000e+00 : f32
    %301 = vector.broadcast %cst_136 : f32 to vector<8x128xf32>
    %302 = arith.maximumf %300, %301 : vector<8x128xf32>
    %303 = vector.broadcast %221 : vector<1x128xf32> to vector<8x128xf32>
    %304 = arith.mulf %302, %303 : vector<8x128xf32>
    %cst_137 = arith.constant dense<0.000000e+00> : vector<8xf32>
    %305 = vector.multi_reduction <add>, %304, %cst_137 [1] : vector<8x128xf32> to vector<8xf32>
    %306 = vector.shape_cast %305 : vector<8xf32> to vector<8x1xf32>
    %307 = vector.broadcast %223 : vector<1x1xf32> to vector<8x1xf32>
    %308 = arith.addf %306, %307 : vector<8x1xf32>
    %309 = tpu.concatenate %102, %205, %308 in 1 : vector<8x1xf32>, vector<8x1xf32>, vector<8x1xf32> -> vector<8x3xf32>
    %c0_138 = arith.constant 0 : index
    %c0_139 = arith.constant 0 : index
    %310 = vector.load %arg6[%c0_138, %c0_139] : memref<8x3xf32, #tpu.memory_space<vmem>>, vector<8x3xf32>
    tpu.vector_store %arg6[%c0_138, %c0_139], %309 {strides = array<i32>} : memref<8x3xf32, #tpu.memory_space<vmem>>, vector<8x3xf32>,
    return
  }
  func.func @transform_0(%arg0: i32) -> (i32, i32, i32) {
    %c0_i32 = arith.constant 0 : i32
    %c0_i32_0 = arith.constant 0 : i32
    %c0_i32_1 = arith.constant 0 : i32
    %c0_i32_2 = arith.constant 0 : i32
    return %c0_i32, %c0_i32_0, %c0_i32_1 : i32, i32, i32
  }
  func.func @transform_1(%arg0: i32) -> (i32, i32, i32) {
    %c0_i32 = arith.constant 0 : i32
    %c0_i32_0 = arith.constant 0 : i32
    %c0_i32_1 = arith.constant 0 : i32
    %c0_i32_2 = arith.constant 0 : i32
    return %c0_i32, %c0_i32_0, %c0_i32_1 : i32, i32, i32
  }
  func.func @transform_2(%arg0: i32) -> (i32, i32, i32) {
    %c0_i32 = arith.constant 0 : i32
    %c0_i32_0 = arith.constant 0 : i32
    %c0_i32_1 = arith.constant 0 : i32
    %c0_i32_2 = arith.constant 0 : i32
    return %c0_i32, %c0_i32_0, %c0_i32_1 : i32, i32, i32
  }
  func.func @transform_3(%arg0: i32) -> (i32, i32, i32) {
    %c0_i32 = arith.constant 0 : i32
    %c0_i32_0 = arith.constant 0 : i32
    %c0_i32_1 = arith.constant 0 : i32
    %c0_i32_2 = arith.constant 0 : i32
    return %c0_i32, %c0_i32_0, %c0_i32_1 : i32, i32, i32
  }
  func.func @transform_4(%arg0: i32) -> (i32, i32, i32) {
    %c0_i32 = arith.constant 0 : i32
    %c0_i32_0 = arith.constant 0 : i32
    %c0_i32_1 = arith.constant 0 : i32
    %c0_i32_2 = arith.constant 0 : i32
    return %c0_i32, %c0_i32_0, %c0_i32_1 : i32, i32, i32
  }
  func.func @transform_5(%arg0: i32) -> (i32, i32) {
    %c0_i32 = arith.constant 0 : i32
    %c0_i32_0 = arith.constant 0 : i32
    %c0_i32_1 = arith.constant 0 : i32
    return %c0_i32, %c0_i32_0 : i32, i32
  }
}

</mosaic_0001>

<bundles_post_ra>
// kernel: forward.1
= control target key start
LH: loop header
LB: loop body
LE: loop exit
PB: predicated region body
PF: predicated region fallthrough
CT: control target
= control target key end

     0   :  { %v1921_v0 = vmov 0.0   ;;  %vm1922_vm0 = vmmov 0   ;;  %vm75_vm1 = vcmask 392192   ;;  %vm145_vm2 = vcmask 261120   ;;  %s1924_s27 = smov 1   ;;  %s1925_s29 = smov 2   ;;  %s2415_s1 = inlined_call_operand.vmem [shape: bf16[3,48,32], index: 1, kind: input, shape index: {}]   ;;  %s2416_s0 = inlined_call_operand.vmem [shape: bf16[3,40,48], index: 0, kind: input, shape index: {}]   ;;  %s2417_s4 = inlined_call_operand.vmem [shape: f32[3,40,256], index: 4, kind: input, shape index: {}]   ;;  %s2418_s2 = inlined_call_operand.vmem [shape: bf16[3,32,256], index: 2, kind: input, shape index: {}]   ;;  %s2419_s3 = inlined_call_operand.vmem [shape: bf16[3,256,128], index: 3, kind: input, shape index: {}]   ;;  %s2420_s5 = inlined_call_operand.vmem [shape: f32[8,3], index: 5, kind: output, shape index: {}]  }
   0x1   :  { %1740 = vmatprep.subr.bf16.mxu0 %v1921_v0  ;;  %v1801_v1 = vld [vmem:[%s2415_s1 + $0x10] sm:$0xff]   ;;  %1746 = vmatprep.mubr.msk.bf16.mxu0 %vm1922_vm0, %v1921_v0  ;;  %v1802_v2 = vld [vmem:[%s2415_s1 + $0x8] sm:$0xff]   ;;  %v1803_v3 = vld [vmem:[%s2415_s1] sm:$0xff]   ;;  %v1923_v33 = vmov 0   ;;  %vm1437_vm3 = vcmask 7168   ;;  %vm1439_vm4 = vcmask 15360  }
   0x2   :  { %1741 = vmatpush3.bf16.msra.mxu0 %v1801_v1  ;;  %v1804_v4 = vld [vmem:[%s2416_s0] sm:$0xff]   ;;  %v1805_v5 = vld [vmem:[%s2416_s0 + $0x8] sm:$0xff]   ;;  %v1806_v6 = vld [vmem:[%s2416_s0 + $0x10] ss:$0 sps:$4 sm:$0xff]   ;;  %1800 = vset.pattern.permute.xlu1 %v1923_v33  ;;  %vm1441_vm5 = vcmask 23552  }
   0x3   :  { %1742 = vmatprep.subr.bf16.mxu0 %v1921_v0  ;;  %v32_v14 = vld [vmem:[%s2417_s4] ss:$0 sm:$0xff]  ;;  %1799 = vset.pattern.permute.xlu0 %v1923_v33  ;;  %v40_v37 = vld [vmem:[%s2417_s4 + $0x10] sm:$0xff] }
   0x4   :  { %v41_v39 = vld [vmem:[%s2417_s4 + $0x20] sm:$0xff]  ;;  %v42_v43 = vld [vmem:[%s2417_s4 + $0x30] sm:$0xff] }
   0x5   :  { %v43_v47 = vld [vmem:[%s2417_s4 + $0x40] sm:$0xff] }
   0x6   :  { %1743 = vmatpush3.bf16.msra.mxu0 %v1802_v2 }
   0x7   :  { %1744 = vmatprep.subr.bf16.mxu0 %v1921_v0 }
   0xa   :  { %1745 = vmatpush3.bf16.msra.mxu0 %v1803_v3 }
   0xd   :  { %1747 = vmatmul.mubr.msk.bf16.vlgmr.msra.gmra.mxu0 %vm75_vm1, %v1804_v4 }
   0xe   :  { %1750 = vmatprep.mubr.msk.bf16.mxu0 %vm1922_vm0, %v1921_v0 }
  0x15   :  { %1751 = vmatmul.mubr.msk.bf16.gmra.mxu0 %vm75_vm1, %v1805_v5 }
  0x16   :  { %1754 = vmatprep.mubr.msk.bf16.mxu0 %vm1922_vm0, %v1921_v0 }
  0x1d   :  { %1755 = vmatmul.mubr.msk.bf16.gmra.mxu0 %vm75_vm1, %v1806_v6 }
  0x1e   :  { %303 = vmatprep.mubr.bf16.mxu0 %v1923_v33 }
  0xcd   :  { %v119_v7 = vpop.f32.mrf.mxu0 }
  0xce   :  { %v1989_v17 = vadd.f32 %v119_v7, %v32_v14 }
  0xcf   :  { %v1748_v8 = vpop.f32.mrf.mxu0 }
  0xd1   :  { %v122_v9 = vpop.f32.mrf.mxu0 }
  0xd2   :  { %v1993_v21 = vadd.f32 %v122_v9, %v32_v14 }
  0xd3   :  { %v1749_v10 = vpop.f32.mrf.mxu0 }
  0xd5   :  { %v127_v11 = vpop.f32.mrf.mxu0 }
  0xd6   :  { %v1991_v18 = vadd.f32 %v127_v11, %v32_v14 }
  0xd7   :  { %v1752_v12 = vpop.f32.mrf.mxu0 }
  0xd9   :  { %v130_v13 = vpop.f32.mrf.mxu0 }
  0xda   :  { %v1995_v22 = vadd.f32 %v130_v13, %v32_v14 }
  0xdb   :  { %v1753_v15 = vpop.f32.mrf.mxu0 }
  0xdd   :  { %v135_v16 = vpop.f32.mrf.mxu0 }
  0xde   :  { %v136_v19 = vadd.f32 %v135_v16, %v32_v14 }
  0xdf   :  { %v1756_v20 = vpop.f32.mrf.mxu0 }
  0xe0   :  { %v143_v23 = vmul.f32 %v136_v19, %v1991_v18  ;;  %v141_v24 = vmul.f32 %v136_v19, %v1989_v17  ;;  %v144_v28 = vmul.f32 %v136_v19, %v1995_v22  ;;  %v142_v29 = vmul.f32 %v136_v19, %v1993_v21 }
  0xe1   :  { %v138_v25 = vpop.f32.mrf.mxu0 }
  0xe2   :  { %v152_v26 = vsel %vm145_vm2, %v143_v23, 0.0  ;;  %v146_v27 = vsel %vm145_vm2, %v141_v24, 0.0  ;;  %v155_v31 = vsel %vm145_vm2, %v144_v28, 0.0  ;;  %v149_v32 = vsel %vm145_vm2, %v142_v29, 0.0 }
  0xe3   :  { %153 = vadd.xlane.f32.xlu1 %v152_v26  ;;  %147 = vadd.xlane.f32.xlu0 %v146_v27  ;;  %v1757_v30 = vpop.f32.mrf.mxu0 }
  0xe4   :  { %v1812_v30 = vld [vmem:[%s2418_s2 + $0x4] ss:$8 sps:$4 sm:$0xff]  }
  0xe7   :  { %156 = vadd.xlane.f32.xlu1 %v155_v31  ;;  %150 = vadd.xlane.f32.xlu0 %v149_v32  ;;  %v1819_v31 = vld [vmem:[%s2419_s3 + $0x78] sm:$0xff]  }
  0xe8   :  { %v1820_v32 = vld [vmem:[%s2419_s3 + $0x38] sm:$0xff]   ;;  %1662 = vmatprep.subr.bf16.mxu1 %v1819_v31 }
  0xe9   :  { %1663 = vmatpush3.bf16.msra.mxu1 %v1820_v32 }
 0x16c   :  { %v154_v34 = vpop.xlane.xlu1 %153  ;;  %v148_v35 = vpop.xlane.xlu0 %147 }
 0x16d   :  { %v158_v36 = vmul.f32 0.6666667, %v148_v35  ;;  %v160_v41 = vmul.f32 0.6666667, %v154_v34  ;;  %v1821_v34 = vld [vmem:[%s2419_s3 + $0x70] sm:$0xff]  }
 0x16e   :  { %v1822_v35 = vld [vmem:[%s2419_s3 + $0x30] sm:$0xff]   ;;  %1664 = vmatprep.subr.bf16.mxu1 %v1821_v34 }
 0x16f   :  { %v162_v44 = vadd.f32 %v158_v36, %v40_v37  ;;  %v164_v48 = vadd.f32 %v160_v41, %v42_v43  ;;  %v1823_v36 = vld [vmem:[%s2419_s3 + $0x68] sm:$0xff]   ;;  %1665 = vmatpush3.bf16.msra.mxu1 %v1822_v35  ;;  %v1828_v41 = vld [vmem:[%s2419_s3 + $0x18] sm:$0xff]   ;;  %v1830_v43 = vld [vmem:[%s2419_s3 + $0x10] sm:$0xff]  }
 0x170   :  { %v157_v38 = vpop.xlane.xlu1 %156  ;;  %v151_v40 = vpop.xlane.xlu0 %150  ;;  %v1824_v37 = vld [vmem:[%s2419_s3 + $0x28] sm:$0xff]   ;;  %1666 = vmatprep.subr.bf16.mxu1 %v1823_v36 }
 0x171   :  { %v159_v42 = vmul.f32 0.6666667, %v151_v40  ;;  %v161_v45 = vmul.f32 0.6666667, %v157_v38  ;;  %v1825_v38 = vld [vmem:[%s2419_s3 + $0x60] sm:$0xff]   ;;  %v1827_v40 = vld [vmem:[%s2419_s3 + $0x58] sm:$0xff]  }
 0x173   :  { %v163_v46 = vadd.f32 %v159_v42, %v41_v39  ;;  %v165_v50 = vadd.f32 %v161_v45, %v43_v47  ;;  %v1826_v39 = vld [vmem:[%s2419_s3 + $0x20] sm:$0xff]   ;;  %1667 = vmatpush3.bf16.msra.mxu1 %v1824_v37  ;;  %v1829_v42 = vld [vmem:[%s2419_s3 + $0x50] sm:$0xff]  }
 0x174   :  { %1668 = vmatprep.subr.bf16.mxu1 %v1825_v38 }
 0x175   :  { %v166_v49 = vmax.f32 %v162_v44, %v163_v46 }
 0x177   :  { %v167_v51 = vmax.f32 %v166_v49, %v164_v48  ;;  %1669 = vmatpush3.bf16.msra.mxu1 %v1826_v39 }
 0x178   :  { %1670 = vmatprep.subr.bf16.mxu1 %v1827_v40 }
 0x179   :  { %v168_v52 = vmax.f32 %v167_v51, %v165_v50 }
 0x17b   :  { %v169_v53 = vsub.f32 %v162_v44, %v168_v52  ;;  %v170_v54 = vsub.f32 %v163_v46, %v168_v52  ;;  %v171_v55 = vsub.f32 %v164_v48, %v168_v52  ;;  %v172_v56 = vsub.f32 %v165_v50, %v168_v52  ;;  %1671 = vmatpush3.bf16.msra.mxu1 %v1828_v41  ;;  %v33_v48 = vld [vmem:[%s2417_s4 + $0x1] ss:$0 sm:$0xff]  ;;  %v34_v50 = vld [vmem:[%s2417_s4 + $0x2] ss:$0 sm:$0xff] }
 0x17c   :  { %1672 = vmatprep.subr.bf16.mxu1 %v1829_v42 }
 0x17d   :  { %v173_v57 = vmul.f32 1.442695, %v169_v53  ;;  %v175_v58 = vmul.f32 1.442695, %v170_v54  ;;  %v177_v59 = vmul.f32 1.442695, %v171_v55 }
 0x17e   :  { %v179_v60 = vmul.f32 1.442695, %v172_v56  ;;  %v1813_v53 = vld [vmem:[%s2415_s1 + $0x28] sm:$0xff]   ;;  %v1814_v55 = vld [vmem:[%s2415_s1 + $0x20] sm:$0xff]   ;;  %v1815_v56 = vld [vmem:[%s2415_s1 + $0x18] sm:$0xff]  }
 0x17f   :  { %1885 = vpow2.f32 %v173_v57  ;;  %1673 = vmatpush3.bf16.msra.mxu1 %v1830_v43  ;;  %v1816_v57 = vld [vmem:[%s2416_s0 + $0x14] sm:$0xff]  }
 0x180   :  { %1887 = vpow2.f32 %v175_v58  ;;  %v1817_v58 = vld [vmem:[%s2416_s0 + $0x1c] sm:$0xff]  }
 0x181   :  { %1889 = vpow2.f32 %v177_v59  ;;  %v1818_v59 = vld [vmem:[%s2416_s0 + $0x24] ss:$0 sps:$4 sm:$0xff]  }
 0x182   :  { %1891 = vpow2.f32 %v179_v60  ;;  %v1831_v60 = vld [vmem:[%s2419_s3 + $0x48] sm:$0xff]  }
 0x183   :  { %1674 = vmatprep.subr.bf16.mxu1 %v1831_v60 }
 0x18c   :  { %v1886_v61 = vpop.eup %1885 }
 0x18d   :  { %v1888_v62 = vpop.eup %1887 }
 0x18e   :  { %v181_v63 = vadd.f32 %v1888_v62, %v1886_v61  ;;  %v1890_v1 = vpop.eup %1889 }
 0x18f   :  { %v1892_v3 = vpop.eup %1891 }
 0x190   :  { %v182_v2 = vadd.f32 %v1890_v1, %v181_v63  ;;  %v1834_v63 = vld [vmem:[%s2419_s3] sm:$0xff]  }
 0x192   :  { %v183_v4 = vadd.f32 %v1892_v3, %v182_v2 }
 0x194   :  { %1893 = vrcp.f32 %v183_v4  ;;  %v1449_v4 = vld [vmem:[%s2417_s4 + $0x3] ss:$8 sm:$0x3] }
 0x1a1   :  { %v1894_v5 = vpop.eup %1893 }
 0x1a2   :  { %v186_v6 = vmul.f32 %v1894_v5, %v1888_v62  ;;  %v185_v7 = vmul.f32 %v1894_v5, %v1886_v61  ;;  %v187_v8 = vmul.f32 %v1894_v5, %v1890_v1  ;;  %v188_v9 = vmul.f32 %v1894_v5, %v1892_v3  ;;  %v1832_v61 = vld [vmem:[%s2419_s3 + $0x8] sm:$0xff]   ;;  %v1833_v62 = vld [vmem:[%s2419_s3 + $0x40] sm:$0xff]  }
 0x1a3   :  { %1675 = vmatpush3.bf16.msra.mxu1 %v1832_v61  ;;  %v238_v1 = vlaneseq }
 0x1a4   :  { %196 = vperm.xlu1 %1800, %v186_v6   ;;  %191 = vperm.xlu0 %1799, %v185_v7  }
 0x1a5   :  { %1676 = vmatprep.subr.bf16.mxu1 %v1833_v62  ;;  %v239_v2 = vshrl.u32 %v238_v1, 7 }
 0x1a7   :  { %1677 = vmatpush3.bf16.msra.mxu1 %v1834_v63  ;;  %v2123_v3 = vsub.s32 0, %v239_v2  ;;  %v2128_v5 = vsub.s32 1, %v239_v2 }
 0x1a8   :  { %201 = vperm.xlu1 %1800, %v187_v8  }
 0x1a9   :  { %v241_v6 = vrot.slane %v1449_v4, %v2123_v3  ;;  %v245_v7 = vrot.slane %v1449_v4, %v2128_v5 }
 0x1ac   :  { %206 = vperm.xlu1 %1800, %v188_v9  }
 0x21f   :  { %v197_v10 = vpop.permute.xlu1 %196  ;;  %v192_v11 = vpop.permute.xlu0 %191 }
 0x220   :  { %v210_v12 = vmul.f32 %v197_v10, %v1993_v21  ;;  %v209_v13 = vmul.f32 %v192_v11, %v1989_v17  ;;  %v1809_v17 = vld [vmem:[%s2418_s2 + $0x14] ss:$8 sps:$4 sm:$0xff]  }
 0x221   :  { %283 = vmatprep.subr.bf16.mxu0 %v1809_v17 }
 0x222   :  { %v213_v16 = vadd.f32 %v210_v12, %v209_v13 }
 0x223   :  { %v202_v14 = vpop.permute.xlu1 %201 }
 0x224   :  { %v211_v15 = vmul.f32 %v202_v14, %v1991_v18  ;;  %v1807_v18 = vld [vmem:[%s2418_s2 + $0x10] ss:$8 sps:$4 sm:$0xff]  }
 0x225   :  { %284 = vmatpush1.bf16.msra.mxu0 %v1807_v18 }
 0x226   :  { %v214_v20 = vadd.f32 %v213_v16, %v211_v15  ;;  %285 = vmatprep.subr.bf16.mxu0 %v1812_v30 }
 0x227   :  { %v207_v19 = vpop.permute.xlu1 %206 }
 0x228   :  { %v212_v23 = vmul.f32 %v207_v19, %v1995_v22  ;;  %v1810_v22 = vld [vmem:[%s2418_s2] ss:$8 sps:$4 sm:$0xff]  }
 0x229   :  { %286 = vmatpush1.bf16.msra.mxu0 %v1810_v22 }
 0x22a   :  { %v215_v24 = vadd.f32 %v214_v20, %v212_v23  ;;  %1758 = vmatprep.subr.bf16.mxu0 %v1921_v0 }
 0x22c   :  { %v216_v25 = vsel %vm145_vm2, %v215_v24, 0.0 }
 0x22d   :  { %217 = vadd.xlane.f32.xlu1 %v216_v25 }
 0x2b6   :  { %v218_v26 = vpop.xlane.xlu1 %217 }
 0x2b7   :  { %v220_v27 = vmul.f32 0.03125, %v218_v26 }
 0x2b9   :  { %v221_v28 = vsub.f32 %v215_v24, %v220_v27 }
 0x2bb   :  { %v222_v29 = vmul.f32 %v221_v28, %v221_v28 }
 0x2bd   :  { %v223_v21 = vsel %vm145_vm2, %v222_v29, 0.0  ;;  %v1491_v29 = vld [vmem:[%s2417_s4 + $0x50] ss:$0 sm:$0xff] }
 0x2be   :  { %224 = vadd.xlane.f32.xlu0 %v223_v21 }
 0x347   :  { %v225_v44 = vpop.xlane.xlu0 %224 }
 0x348   :  { %v226_v45 = vmul.f32 0.03125, %v225_v44 }
 0x34a   :  { %v227_v46 = vadd.f32 1e-05, %v226_v45 }
 0x34c   :  { %1895 = vrsqrt.f32 %v227_v46 }
 0x359   :  { %v1896_v47 = vpop.eup %1895 }
 0x35a   :  { %v229_v49 = vmul.f32 %v1896_v47, %v221_v28 }
 0x35c   :  { %v230_v51 = vmul.f32 %v229_v49, %v33_v48  ;;  %v1499_v48 = vld [vmem:[%s2417_s4 + $0x70] sm:$0xff] }
 0x35e   :  { %v231_v52 = vadd.f32 %v230_v51, %v34_v50  ;;  %v1498_v50 = vld [vmem:[%s2417_s4 + $0x60] sm:$0xff] }
 0x35f   :  { %v1500_v51 = vld [vmem:[%s2417_s4 + $0x80] sm:$0xff] }
 0x360   :  { %v232_v54 = vpack.c.bf16 %v231_v52, %v231_v52 }
 0x362   :  { %1463 = vmatmul.mubr.msk.bf16.vlgmr.msra.gmra.mxu0 %vm145_vm2, %v232_v54 }
 0x363   :  { %1759 = vmatpush3.bf16.msra.mxu0 %v1813_v53  ;;  %1764 = vmatprep.mubr.msk.bf16.mxu0 %vm1922_vm0, %v1921_v0 }
 0x364   :  { %1760 = vmatprep.subr.bf16.mxu0 %v1921_v0 }
 0x367   :  { %1761 = vmatpush3.bf16.msra.mxu0 %v1814_v55 }
 0x368   :  { %1762 = vmatprep.subr.bf16.mxu0 %v1921_v0 }
 0x36b   :  { %1763 = vmatpush3.bf16.msra.mxu0 %v1815_v56 }
 0x36e   :  { %1765 = vmatmul.mubr.msk.bf16.vlgmr.msra.gmra.mxu0 %vm75_vm1, %v1816_v57  ;;  %v1501_v57 = vld [vmem:[%s2417_s4 + $0x90] sm:$0xff] }
 0x36f   :  { %1768 = vmatprep.mubr.msk.bf16.mxu0 %vm1922_vm0, %v1921_v0 }
 0x376   :  { %1769 = vmatmul.mubr.msk.bf16.gmra.mxu0 %vm75_vm1, %v1817_v58 }
 0x377   :  { %1772 = vmatprep.mubr.msk.bf16.mxu0 %vm1922_vm0, %v1921_v0 }
 0x37e   :  { %1773 = vmatmul.mubr.msk.bf16.gmra.mxu0 %vm75_vm1, %v1818_v59 }
 0x422   :  { %v305_v8 = vpop.f32.mrf.mxu0 }
 0x423   :  { %v306_v9 = vadd.f32 %v305_v8, %v241_v6 }
 0x424   :  { %v307_v10 = vpop.f32.mrf.mxu0 }
 0x425   :  { %v308_v11 = vadd.f32 %v307_v10, %v245_v7  ;;  %v312_v12 = vmax.f32 %v306_v9, 0.0 }
 0x426   :  { %v309_v13 = vpop.f32.mrf.mxu0 }
 0x427   :  { %v313_v14 = vmax.f32 %v308_v11, 0.0  ;;  %v314_v19 = vpack.c.bf16 %v312_v12, %v312_v12 }
 0x428   :  { %v310_v15 = vpop.f32.mrf.mxu0 }
 0x429   :  { %v315_v16 = vpack.c.bf16 %v313_v14, %v313_v14 }
 0x42b   :  { %476 = vmatprep.mubr.bf16.mxu1 %v315_v16 }
 0x42c   :  { %477 = vmatmul.mubr.bf16.vlgmr.msra.gmra.mxu1 %v314_v19 }
 0x42d   :  { %772 = vmatprep.mubr.bf16.mxu1 %v1923_v33 }
 0x42e   :  { %v589_v20 = vpop.f32.mrf.mxu0 }
 0x42f   :  { %v2136_v18 = vadd.f32 %v1491_v29, %v589_v20 }
 0x430   :  { %v1766_v23 = vpop.f32.mrf.mxu0 }
 0x432   :  { %v592_v24 = vpop.f32.mrf.mxu0 }
 0x433   :  { %v2138_v31 = vadd.f32 %v1491_v29, %v592_v24 }
 0x434   :  { %v1767_v25 = vpop.f32.mrf.mxu0 }
 0x436   :  { %v597_v26 = vpop.f32.mrf.mxu0 }
 0x437   :  { %v2143_v38 = vadd.f32 %v1491_v29, %v597_v26 }
 0x438   :  { %v1770_v27 = vpop.f32.mrf.mxu0 }
 0x43a   :  { %v600_v28 = vpop.f32.mrf.mxu0 }
 0x43b   :  { %v2147_v41 = vadd.f32 %v1491_v29, %v600_v28 }
 0x43c   :  { %v1771_v21 = vpop.f32.mrf.mxu0 }
 0x43e   :  { %v605_v17 = vpop.f32.mrf.mxu0 }
 0x43f   :  { %v606_v22 = vadd.f32 %v1491_v29, %v605_v17 }
 0x440   :  { %v1774_v30 = vpop.f32.mrf.mxu0 }
 0x441   :  { %v611_v32 = vmul.f32 %v606_v22, %v2136_v18  ;;  %v612_v36 = vmul.f32 %v606_v22, %v2138_v31  ;;  %v613_v40 = vmul.f32 %v606_v22, %v2143_v38  ;;  %v614_v43 = vmul.f32 %v606_v22, %v2147_v41 }
 0x442   :  { %v608_v34 = vpop.f32.mrf.mxu0 }
 0x443   :  { %v615_v35 = vsel %vm145_vm2, %v611_v32, 0.0  ;;  %v618_v39 = vsel %vm145_vm2, %v612_v36, 0.0  ;;  %v621_v42 = vsel %vm145_vm2, %v613_v40, 0.0  ;;  %v624_v44 = vsel %vm145_vm2, %v614_v43, 0.0 }
 0x444   :  { %616 = vadd.xlane.f32.xlu1 %v615_v35  ;;  %v1775_v37 = vpop.f32.mrf.mxu0 }
 0x448   :  { %619 = vadd.xlane.f32.xlu1 %v618_v39 }
 0x44c   :  { %622 = vadd.xlane.f32.xlu1 %v621_v42 }
 0x450   :  { %625 = vadd.xlane.f32.xlu1 %v624_v44 }
 0x4cd   :  { %v617_v45 = vpop.xlane.xlu1 %616 }
 0x4ce   :  { %v627_v49 = vmul.f32 0.6666667, %v617_v45 }
 0x4d0   :  { %v631_v55 = vadd.f32 %v1498_v50, %v627_v49  ;;  %v1838_v49 = vld [vmem:[%s2418_s2 + $0x20] ss:$8 sps:$4 sm:$0xff]   ;;  %v1847_v50 = vld [vmem:[%s2419_s3 + $0xf8] sm:$0xff]  }
 0x4d1   :  { %v620_v46 = vpop.xlane.xlu1 %619  ;;  %1690 = vmatprep.subr.bf16.mxu0 %v1847_v50 }
 0x4d2   :  { %v628_v47 = vmul.f32 0.6666667, %v620_v46 }
 0x4d4   :  { %v632_v53 = vadd.f32 %v1499_v48, %v628_v47 }
 0x4d5   :  { %v623_v52 = vpop.xlane.xlu1 %622 }
 0x4d6   :  { %v629_v54 = vmul.f32 0.6666667, %v623_v52  ;;  %v635_v59 = vmax.f32 %v631_v55, %v632_v53  ;;  %v1849_v52 = vld [vmem:[%s2419_s3 + $0xf0] sm:$0xff]  }
 0x4d8   :  { %v633_v56 = vadd.f32 %v1500_v51, %v629_v54  ;;  %v1848_v51 = vld [vmem:[%s2419_s3 + $0xb8] sm:$0xff]   ;;  %v1851_v54 = vld [vmem:[%s2419_s3 + $0xe8] sm:$0xff]  }
 0x4d9   :  { %v626_v58 = vpop.xlane.xlu1 %625  ;;  %1691 = vmatpush3.bf16.msra.mxu0 %v1848_v51 }
 0x4da   :  { %v630_v60 = vmul.f32 0.6666667, %v626_v58  ;;  %v636_v61 = vmax.f32 %v635_v59, %v633_v56  ;;  %1692 = vmatprep.subr.bf16.mxu0 %v1849_v52  ;;  %v1855_v58 = vld [vmem:[%s2419_s3 + $0xd8] sm:$0xff]  }
 0x4db   :  { %v1856_v59 = vld [vmem:[%s2419_s3 + $0x98] sm:$0xff]  }
 0x4dc   :  { %v634_v62 = vadd.f32 %v1501_v57, %v630_v60  ;;  %v1854_v57 = vld [vmem:[%s2419_s3 + $0xa0] sm:$0xff]   ;;  %v1857_v60 = vld [vmem:[%s2419_s3 + $0xd0] sm:$0xff]  }
 0x4de   :  { %v637_v63 = vmax.f32 %v636_v61, %v634_v62  ;;  %v1858_v61 = vld [vmem:[%s2419_s3 + $0x90] sm:$0xff]  }
 0x4e0   :  { %v638_v1 = vsub.f32 %v631_v55, %v637_v63  ;;  %v639_v2 = vsub.f32 %v632_v53, %v637_v63  ;;  %v640_v4 = vsub.f32 %v633_v56, %v637_v63  ;;  %v641_v6 = vsub.f32 %v634_v62, %v637_v63  ;;  %v1850_v53 = vld [vmem:[%s2419_s3 + $0xb0] sm:$0xff]   ;;  %v1852_v55 = vld [vmem:[%s2419_s3 + $0xa8] sm:$0xff]   ;;  %v1853_v56 = vld [vmem:[%s2419_s3 + $0xe0] sm:$0xff]  }
 0x4e1   :  { %1693 = vmatpush3.bf16.msra.mxu0 %v1850_v53 }
 0x4e2   :  { %v642_v7 = vmul.f32 1.442695, %v638_v1  ;;  %v644_v8 = vmul.f32 1.442695, %v639_v2  ;;  %v646_v9 = vmul.f32 1.442695, %v640_v4  ;;  %1694 = vmatprep.subr.bf16.mxu0 %v1851_v54 }
 0x4e3   :  { %v648_v10 = vmul.f32 1.442695, %v641_v6  ;;  %v1492_v4 = vld [vmem:[%s2417_s4 + $0x51] ss:$0 sm:$0xff] }
 0x4e4   :  { %1897 = vpow2.f32 %v642_v7  ;;  %v1493_v7 = vld [vmem:[%s2417_s4 + $0x52] ss:$0 sm:$0xff] }
 0x4e5   :  { %1899 = vpow2.f32 %v644_v8  ;;  %1695 = vmatpush3.bf16.msra.mxu0 %v1852_v55 }
 0x4e6   :  { %1901 = vpow2.f32 %v646_v9  ;;  %1696 = vmatprep.subr.bf16.mxu0 %v1853_v56 }
 0x4e7   :  { %1903 = vpow2.f32 %v648_v10  ;;  %v1841_v10 = vld [vmem:[%s2415_s1 + $0x40] sm:$0xff]  }
 0x4e9   :  { %1697 = vmatpush3.bf16.msra.mxu0 %v1854_v57 }
 0x4ea   :  { %1698 = vmatprep.subr.bf16.mxu0 %v1855_v58 }
 0x4ec   :  { %v1678_v11 = vpop.f32.mrf.mxu1 }
 0x4ed   :  { %1699 = vmatpush3.bf16.msra.mxu0 %v1856_v59 }
 0x4ee   :  { %v1679_v12 = vpop.f32.mrf.mxu1  ;;  %1700 = vmatprep.subr.bf16.mxu0 %v1857_v60  ;;  %v1587_v60 = vld [vmem:[%s2417_s4 + $0xc0] sm:$0xff] }
 0x4ef   :  { %v2164_v13 = vadd.f32 %v1679_v12, %v1678_v11  ;;  %v1842_v12 = vld [vmem:[%s2415_s1 + $0x38] sm:$0xff]  }
 0x4f0   :  { %v1681_v14 = vpop.f32.mrf.mxu1 }
 0x4f1   :  { %v1898_v15 = vpop.eup %1897  ;;  %1701 = vmatpush3.bf16.msra.mxu0 %v1858_v61  ;;  %v1843_v14 = vld [vmem:[%s2415_s1 + $0x30] sm:$0xff]  }
 0x4f2   :  { %v1900_v16 = vpop.eup %1899  ;;  %v1682_v19 = vpop.f32.mrf.mxu1 }
 0x4f3   :  { %v650_v20 = vadd.f32 %v1900_v16, %v1898_v15  ;;  %v1902_v23 = vpop.eup %1901  ;;  %v1846_v19 = vld [vmem:[%s2416_s0 + $0x38] ss:$0 sps:$4 sm:$0xff]  }
 0x4f4   :  { %v1904_v25 = vpop.eup %1903 }
 0x4f5   :  { %v651_v24 = vadd.f32 %v1902_v23, %v650_v20  ;;  %v1859_v20 = vld [vmem:[%s2419_s3 + $0xc8] sm:$0xff]  }
 0x4f6   :  { %1702 = vmatprep.subr.bf16.mxu0 %v1859_v20 }
 0x4f7   :  { %v652_v26 = vadd.f32 %v1904_v25, %v651_v24  ;;  %v1862_v24 = vld [vmem:[%s2419_s3 + $0x80] sm:$0xff]  }
 0x4f9   :  { %1905 = vrcp.f32 %v652_v26 }
 0x506   :  { %v1906_v27 = vpop.eup %1905 }
 0x507   :  { %v655_v28 = vmul.f32 %v1906_v27, %v1900_v16  ;;  %v654_v29 = vmul.f32 %v1906_v27, %v1898_v15  ;;  %v656_v21 = vmul.f32 %v1906_v27, %v1902_v23  ;;  %v657_v17 = vmul.f32 %v1906_v27, %v1904_v25  ;;  %v1844_v15 = vld [vmem:[%s2416_s0 + $0x28] sm:$0xff]   ;;  %v1845_v16 = vld [vmem:[%s2416_s0 + $0x30] sm:$0xff]  }
 0x508   :  { %v1860_v23 = vld [vmem:[%s2419_s3 + $0x88] sm:$0xff]   ;;  %v1494_v25 = vld [vmem:[%s2417_s4 + $0x53] ss:$8 sm:$0x3] }
 0x509   :  { %665 = vperm.xlu1 %1800, %v655_v28   ;;  %660 = vperm.xlu0 %1799, %v654_v29   ;;  %v710_v26 = vrot.slane %v1494_v25, %v2123_v3  ;;  %v714_v27 = vrot.slane %v1494_v25, %v2128_v5 }
 0x50a   :  { %1703 = vmatpush3.bf16.msra.mxu0 %v1860_v23 }
 0x50d   :  { %670 = vperm.xlu1 %1800, %v656_v21   ;;  %675 = vperm.xlu0 %1799, %v657_v17  }
 0x584   :  { %v666_v22 = vpop.permute.xlu1 %665  ;;  %v661_v30 = vpop.permute.xlu0 %660 }
 0x585   :  { %v679_v32 = vmul.f32 %v666_v22, %v2138_v31  ;;  %v678_v34 = vmul.f32 %v661_v30, %v2136_v18  ;;  %v1837_v18 = vld [vmem:[%s2418_s2 + $0x34] ss:$8 sps:$4 sm:$0xff]  }
 0x586   :  { %752 = vmatprep.subr.bf16.mxu1 %v1837_v18 }
 0x587   :  { %v682_v37 = vadd.f32 %v679_v32, %v678_v34 }
 0x588   :  { %v671_v35 = vpop.permute.xlu1 %670  ;;  %v676_v36 = vpop.permute.xlu0 %675 }
 0x589   :  { %v680_v39 = vmul.f32 %v671_v35, %v2143_v38  ;;  %v681_v42 = vmul.f32 %v676_v36, %v2147_v41  ;;  %v1835_v38 = vld [vmem:[%s2418_s2 + $0x30] ss:$8 sps:$4 sm:$0xff]   ;;  %v1840_v41 = vld [vmem:[%s2418_s2 + $0x24] ss:$8 sps:$4 sm:$0xff]  }
 0x58a   :  { %753 = vmatpush1.bf16.msra.mxu1 %v1835_v38 }
 0x58b   :  { %v683_v40 = vadd.f32 %v682_v37, %v680_v39  ;;  %754 = vmatprep.subr.bf16.mxu1 %v1840_v41 }
 0x58d   :  { %v684_v43 = vadd.f32 %v683_v40, %v681_v42 }
 0x58e   :  { %755 = vmatpush1.bf16.msra.mxu1 %v1838_v49 }
 0x58f   :  { %v685_v44 = vsel %vm145_vm2, %v684_v43, 0.0  ;;  %1776 = vmatprep.subr.bf16.mxu1 %v1921_v0 }
 0x590   :  { %686 = vadd.xlane.f32.xlu1 %v685_v44 }
 0x619   :  { %v687_v45 = vpop.xlane.xlu1 %686 }
 0x61a   :  { %v688_v46 = vmul.f32 0.03125, %v687_v45 }
 0x61c   :  { %v689_v47 = vsub.f32 %v684_v43, %v688_v46  ;;  %v1579_v46 = vld [vmem:[%s2417_s4 + $0xa0] ss:$0 sm:$0xff] }
 0x61e   :  { %v690_v48 = vmul.f32 %v689_v47, %v689_v47 }
 0x620   :  { %v691_v31 = vsel %vm145_vm2, %v690_v48, 0.0 }
 0x621   :  { %692 = vadd.xlane.f32.xlu0 %v691_v31 }
 0x6aa   :  { %v693_v62 = vpop.xlane.xlu0 %692 }
 0x6ab   :  { %v694_v63 = vmul.f32 0.03125, %v693_v62  ;;  %v1586_v62 = vld [vmem:[%s2417_s4 + $0xb0] sm:$0xff] }
 0x6ad   :  { %v695_v1 = vadd.f32 1e-05, %v694_v63 }
 0x6af   :  { %1907 = vrsqrt.f32 %v695_v1 }
 0x6bc   :  { %v1908_v2 = vpop.eup %1907 }
 0x6bd   :  { %v697_v6 = vmul.f32 %v1908_v2, %v689_v47 }
 0x6bf   :  { %v698_v8 = vmul.f32 %v1492_v4, %v697_v6 }
 0x6c1   :  { %v699_v9 = vadd.f32 %v1493_v7, %v698_v8  ;;  %v1588_v8 = vld [vmem:[%s2417_s4 + $0xd0] sm:$0xff] }
 0x6c3   :  { %v700_v11 = vpack.c.bf16 %v699_v9, %v699_v9 }
 0x6c5   :  { %1519 = vmatmul.mubr.msk.bf16.vlgmr.msra.gmra.mxu1 %vm145_vm2, %v700_v11 }
 0x6c6   :  { %1777 = vmatpush3.bf16.msra.mxu1 %v1841_v10  ;;  %1782 = vmatprep.mubr.msk.bf16.mxu1 %vm1922_vm0, %v1921_v0 }
 0x6c7   :  { %1778 = vmatprep.subr.bf16.mxu1 %v1921_v0 }
 0x6ca   :  { %1779 = vmatpush3.bf16.msra.mxu1 %v1842_v12  ;;  %v1589_v12 = vld [vmem:[%s2417_s4 + $0xe0] sm:$0xff] }
 0x6cb   :  { %1780 = vmatprep.subr.bf16.mxu1 %v1921_v0 }
 0x6ce   :  { %1781 = vmatpush3.bf16.msra.mxu1 %v1843_v14 }
 0x6d1   :  { %1783 = vmatmul.mubr.msk.bf16.vlgmr.msra.gmra.mxu1 %vm75_vm1, %v1844_v15 }
 0x6d2   :  { %1786 = vmatprep.mubr.msk.bf16.mxu1 %vm1922_vm0, %v1921_v0 }
 0x6d9   :  { %1787 = vmatmul.mubr.msk.bf16.gmra.mxu1 %vm75_vm1, %v1845_v16 }
 0x6da   :  { %1790 = vmatprep.mubr.msk.bf16.mxu1 %vm1922_vm0, %v1921_v0  ;;  %v1861_v0 = vld [vmem:[%s2419_s3 + $0xc0] sm:$0xff]  }
 0x6db   :  { %1704 = vmatprep.subr.bf16.mxu0 %v1861_v0 }
 0x6dc   :  { %1705 = vmatpush3.bf16.msra.mxu0 %v1862_v24 }
 0x6e1   :  { %1791 = vmatmul.mubr.msk.bf16.gmra.mxu1 %vm75_vm1, %v1846_v19 }
 0x785   :  { %v774_v28 = vpop.f32.mrf.mxu1 }
 0x786   :  { %v775_v29 = vadd.f32 %v774_v28, %v710_v26 }
 0x787   :  { %v776_v21 = vpop.f32.mrf.mxu1 }
 0x788   :  { %v777_v17 = vadd.f32 %v776_v21, %v714_v27  ;;  %v781_v22 = vmax.f32 %v775_v29, 0.0 }
 0x789   :  { %v778_v30 = vpop.f32.mrf.mxu1 }
 0x78a   :  { %v782_v32 = vmax.f32 %v777_v17, 0.0  ;;  %v783_v36 = vpack.c.bf16 %v781_v22, %v781_v22 }
 0x78b   :  { %v779_v34 = vpop.f32.mrf.mxu1 }
 0x78c   :  { %v784_v35 = vpack.c.bf16 %v782_v32, %v782_v32 }
 0x78e   :  { %946 = vmatprep.mubr.bf16.mxu0 %v784_v35 }
 0x78f   :  { %947 = vmatmul.mubr.bf16.vlgmr.msra.gmra.mxu0 %v783_v36 }
 0x790   :  { %1242 = vmatprep.mubr.bf16.mxu0 %v1923_v33 }
 0x791   :  { %v1059_v37 = vpop.f32.mrf.mxu1 }
 0x792   :  { %v2278_v31 = vadd.f32 %v1579_v46, %v1059_v37 }
 0x793   :  { %v1784_v39 = vpop.f32.mrf.mxu1 }
 0x795   :  { %v1062_v40 = vpop.f32.mrf.mxu1 }
 0x796   :  { %v2280_v18 = vadd.f32 %v1579_v46, %v1062_v40 }
 0x797   :  { %v1785_v42 = vpop.f32.mrf.mxu1 }
 0x799   :  { %v1067_v43 = vpop.f32.mrf.mxu1 }
 0x79a   :  { %v2282_v33 = vadd.f32 %v1579_v46, %v1067_v43 }
 0x79b   :  { %v1788_v44 = vpop.f32.mrf.mxu1 }
 0x79d   :  { %v1070_v45 = vpop.f32.mrf.mxu1 }
 0x79e   :  { %v2284_v49 = vadd.f32 %v1579_v46, %v1070_v45 }
 0x79f   :  { %v1789_v47 = vpop.f32.mrf.mxu1 }
 0x7a1   :  { %v1075_v48 = vpop.f32.mrf.mxu1 }
 0x7a2   :  { %v1076_v38 = vadd.f32 %v1579_v46, %v1075_v48 }
 0x7a3   :  { %v1792_v41 = vpop.f32.mrf.mxu1 }
 0x7a4   :  { %v1082_v50 = vmul.f32 %v1076_v38, %v2280_v18  ;;  %v1081_v51 = vmul.f32 %v1076_v38, %v2278_v31  ;;  %v1084_v55 = vmul.f32 %v1076_v38, %v2284_v49  ;;  %v1083_v56 = vmul.f32 %v1076_v38, %v2282_v33 }
 0x7a5   :  { %v1078_v52 = vpop.f32.mrf.mxu1 }
 0x7a6   :  { %v1088_v53 = vsel %vm145_vm2, %v1082_v50, 0.0  ;;  %v1085_v54 = vsel %vm145_vm2, %v1081_v51, 0.0  ;;  %v1094_v58 = vsel %vm145_vm2, %v1084_v55, 0.0  ;;  %v1091_v59 = vsel %vm145_vm2, %v1083_v56, 0.0 }
 0x7a7   :  { %1089 = vadd.xlane.f32.xlu1 %v1088_v53  ;;  %1086 = vadd.xlane.f32.xlu0 %v1085_v54  ;;  %v1793_v57 = vpop.f32.mrf.mxu1 }
 0x7ab   :  { %1095 = vadd.xlane.f32.xlu1 %v1094_v58  ;;  %1092 = vadd.xlane.f32.xlu0 %v1091_v59  ;;  %v1495_v59 = vld [vmem:[%s2417_s4 + $0x54] ss:$0 sm:$0xff] }
 0x830   :  { %v1090_v61 = vpop.xlane.xlu1 %1089  ;;  %v1087_v63 = vpop.xlane.xlu0 %1086 }
 0x831   :  { %v1098_v1 = vmul.f32 0.6666667, %v1090_v61  ;;  %v1097_v2 = vmul.f32 0.6666667, %v1087_v63 }
 0x833   :  { %v1102_v4 = vadd.f32 %v1587_v60, %v1098_v1  ;;  %v1101_v6 = vadd.f32 %v1586_v62, %v1097_v2  ;;  %v1496_v2 = vld [vmem:[%s2417_s4 + $0x55] ss:$0 sm:$0xff] }
 0x834   :  { %v1096_v7 = vpop.xlane.xlu1 %1095  ;;  %v1093_v9 = vpop.xlane.xlu0 %1092 }
 0x835   :  { %v1100_v10 = vmul.f32 0.6666667, %v1096_v7  ;;  %v1099_v11 = vmul.f32 0.6666667, %v1093_v9  ;;  %v1105_v14 = vmax.f32 %v1101_v6, %v1102_v4  ;;  %v38_v7 = vld [vmem:[%s2417_s4 + $0x5] ss:$0 sm:$0xff] }
 0x836   :  { %v1865_v9 = vld [vmem:[%s2418_s2 + $0x54] ss:$8 sps:$4 sm:$0xff]  }
 0x837   :  { %v1103_v15 = vadd.f32 %v1588_v8, %v1099_v11  ;;  %v1104_v16 = vadd.f32 %v1589_v12, %v1100_v10  ;;  %v1868_v10 = vld [vmem:[%s2418_s2 + $0x44] ss:$8 sps:$4 sm:$0xff]   ;;  %1222 = vmatprep.subr.bf16.mxu0 %v1865_v9  ;;  %v1866_v11 = vld [vmem:[%s2418_s2 + $0x40] ss:$8 sps:$4 sm:$0xff]   ;;  %v1869_v12 = vld [vmem:[%s2419_s3 + $0x178] sm:$0xff]  }
 0x838   :  { %1718 = vmatprep.subr.bf16.mxu1 %v1869_v12 }
 0x839   :  { %v1106_v19 = vmax.f32 %v1105_v14, %v1103_v15  ;;  %v1870_v14 = vld [vmem:[%s2419_s3 + $0x138] sm:$0xff]  }
 0x83a   :  { %1719 = vmatpush3.bf16.msra.mxu1 %v1870_v14 }
 0x83b   :  { %v1107_v20 = vmax.f32 %v1106_v19, %v1104_v16  ;;  %v1873_v19 = vld [vmem:[%s2419_s3 + $0x168] sm:$0xff]  }
 0x83d   :  { %v1108_v23 = vsub.f32 %v1101_v6, %v1107_v20  ;;  %v1109_v0 = vsub.f32 %v1102_v4, %v1107_v20  ;;  %v1110_v24 = vsub.f32 %v1103_v15, %v1107_v20  ;;  %v1111_v25 = vsub.f32 %v1104_v16, %v1107_v20  ;;  %v1871_v15 = vld [vmem:[%s2419_s3 + $0x170] sm:$0xff]   ;;  %v1874_v20 = vld [vmem:[%s2419_s3 + $0x128] sm:$0xff]  }
 0x83e   :  { %v1872_v16 = vld [vmem:[%s2419_s3 + $0x130] sm:$0xff]   ;;  %1720 = vmatprep.subr.bf16.mxu1 %v1871_v15 }
 0x83f   :  { %v1112_v26 = vmul.f32 1.442695, %v1108_v23  ;;  %v1114_v27 = vmul.f32 1.442695, %v1109_v0  ;;  %v1116_v28 = vmul.f32 1.442695, %v1110_v24  ;;  %1721 = vmatpush3.bf16.msra.mxu1 %v1872_v16 }
 0x840   :  { %v1118_v29 = vmul.f32 1.442695, %v1111_v25  ;;  %1722 = vmatprep.subr.bf16.mxu1 %v1873_v19  ;;  %v1875_v23 = vld [vmem:[%s2419_s3 + $0x160] sm:$0xff]   ;;  %v1877_v24 = vld [vmem:[%s2419_s3 + $0x158] sm:$0xff]  }
 0x841   :  { %1909 = vpow2.f32 %v1112_v26  ;;  %v1876_v0 = vld [vmem:[%s2419_s3 + $0x120] sm:$0xff]   ;;  %v1878_v25 = vld [vmem:[%s2419_s3 + $0x118] sm:$0xff]   ;;  %v1879_v26 = vld [vmem:[%s2419_s3 + $0x150] sm:$0xff]  }
 0x842   :  { %1911 = vpow2.f32 %v1114_v27  ;;  %v1880_v27 = vld [vmem:[%s2419_s3 + $0x110] sm:$0xff]  }
 0x843   :  { %1913 = vpow2.f32 %v1116_v28  ;;  %1723 = vmatpush3.bf16.msra.mxu1 %v1874_v20 }
 0x844   :  { %1915 = vpow2.f32 %v1118_v29  ;;  %1724 = vmatprep.subr.bf16.mxu1 %v1875_v23 }
 0x847   :  { %1725 = vmatpush3.bf16.msra.mxu1 %v1876_v0 }
 0x848   :  { %1726 = vmatprep.subr.bf16.mxu1 %v1877_v24 }
 0x84b   :  { %1727 = vmatpush3.bf16.msra.mxu1 %v1878_v25 }
 0x84c   :  { %1728 = vmatprep.subr.bf16.mxu1 %v1879_v26 }
 0x84e   :  { %v1910_v21 = vpop.eup %1909 }
 0x84f   :  { %v1912_v17 = vpop.eup %1911  ;;  %v1706_v22 = vpop.f32.mrf.mxu0  ;;  %1729 = vmatpush3.bf16.msra.mxu1 %v1880_v27 }
 0x850   :  { %v1120_v30 = vadd.f32 %v1912_v17, %v1910_v21  ;;  %v1914_v32 = vpop.eup %1913 }
 0x851   :  { %v1707_v34 = vpop.f32.mrf.mxu0  ;;  %v1916_v37 = vpop.eup %1915 }
 0x852   :  { %v1121_v35 = vadd.f32 %v1914_v32, %v1120_v30  ;;  %v1708_v36 = vadd.f32 %v1707_v34, %v1706_v22  ;;  %v1580_v22 = vld [vmem:[%s2417_s4 + $0xa1] ss:$0 sm:$0xff] }
 0x853   :  { %v1709_v39 = vpop.f32.mrf.mxu0 }
 0x854   :  { %v1122_v40 = vadd.f32 %v1916_v37, %v1121_v35  ;;  %v949_v61 = vadd.f32 %v1708_v36, %v1495_v59  ;;  %v1882_v39 = vld [vmem:[%s2419_s3 + $0x108] sm:$0xff]  }
 0x855   :  { %v1710_v42 = vpop.f32.mrf.mxu0 }
 0x856   :  { %1917 = vrcp.f32 %v1122_v40  ;;  %v1883_v40 = vld [vmem:[%s2419_s3 + $0x140] sm:$0xff]  }
 0x857   :  { %v1884_v42 = vld [vmem:[%s2419_s3 + $0x100] sm:$0xff]  }
 0x863   :  { %v1918_v43 = vpop.eup %1917 }
 0x864   :  { %v1125_v44 = vmul.f32 %v1918_v43, %v1912_v17  ;;  %v1124_v45 = vmul.f32 %v1918_v43, %v1910_v21  ;;  %v1126_v46 = vmul.f32 %v1918_v43, %v1914_v32  ;;  %v1127_v47 = vmul.f32 %v1918_v43, %v1916_v37  ;;  %v1581_v32 = vld [vmem:[%s2417_s4 + $0xa2] ss:$0 sm:$0xff]  ;;  %v1881_v37 = vld [vmem:[%s2419_s3 + $0x148] sm:$0xff]  }
 0x865   :  { %1730 = vmatprep.subr.bf16.mxu1 %v1881_v37  ;;  %v1582_v43 = vld [vmem:[%s2417_s4 + $0xa3] ss:$8 sm:$0x3] }
 0x866   :  { %1135 = vperm.xlu1 %1800, %v1125_v44   ;;  %1130 = vperm.xlu0 %1799, %v1124_v45   ;;  %v1180_v44 = vrot.slane %v1582_v43, %v2123_v3  ;;  %v1184_v45 = vrot.slane %v1582_v43, %v2128_v5 }
 0x867   :  { %1731 = vmatpush3.bf16.msra.mxu1 %v1882_v39 }
 0x868   :  { %1732 = vmatprep.subr.bf16.mxu1 %v1883_v40 }
 0x86a   :  { %1140 = vperm.xlu1 %1800, %v1126_v46   ;;  %1145 = vperm.xlu0 %1799, %v1127_v47  }
 0x86b   :  { %1733 = vmatpush3.bf16.msra.mxu1 %v1884_v42 }
 0x8e1   :  { %v1136_v48 = vpop.permute.xlu1 %1135  ;;  %v1131_v38 = vpop.permute.xlu0 %1130 }
 0x8e2   :  { %v1149_v41 = vmul.f32 %v1136_v48, %v2280_v18  ;;  %v1148_v50 = vmul.f32 %v1131_v38, %v2278_v31  ;;  %v37_v31 = vld [vmem:[%s2417_s4 + $0x4] ss:$0 sm:$0xff] }
 0x8e3   :  { %v479_v63 = vadd.f32 %v2164_v13, %v37_v31  ;;  %v1863_v13 = vld [vmem:[%s2418_s2 + $0x50] ss:$8 sps:$4 sm:$0xff]   ;;  %v1497_v31 = vld [vmem:[%s2417_s4 + $0x56] ss:$0 sm:$0xff] }
 0x8e4   :  { %v1152_v53 = vadd.f32 %v1149_v41, %v1148_v50  ;;  %1223 = vmatpush1.bf16.msra.mxu0 %v1863_v13 }
 0x8e5   :  { %v1141_v51 = vpop.permute.xlu1 %1140  ;;  %v1146_v52 = vpop.permute.xlu0 %1145  ;;  %v484_v4 = vmax.f32 %v479_v63, 0.0  ;;  %1224 = vmatprep.subr.bf16.mxu0 %v1868_v10  ;;  %v1585_v63 = vld [vmem:[%s2417_s4 + $0xa6] ss:$0 sm:$0xff] }
 0x8e6   :  { %v1150_v54 = vmul.f32 %v1141_v51, %v2282_v33  ;;  %v1151_v56 = vmul.f32 %v1146_v52, %v2284_v49  ;;  %v954_v49 = vmax.f32 %v949_v61, 0.0 }
 0x8e7   :  { %v485_v8 = vmul.f32 %v484_v4, %v38_v7 }
 0x8e8   :  { %v1153_v55 = vadd.f32 %v1152_v53, %v1150_v54  ;;  %v955_v6 = vmul.f32 %v1496_v2, %v954_v49  ;;  %1225 = vmatpush1.bf16.msra.mxu0 %v1866_v11  ;;  %v39_v2 = vld [vmem:[%s2417_s4 + $0x6] ss:$0 sm:$0xff] }
 0x8ea   :  { %v1154_v57 = vadd.f32 %v1153_v55, %v1151_v56  ;;  %v1583_v56 = vld [vmem:[%s2417_s4 + $0xa4] ss:$0 sm:$0xff] }
 0x8ec   :  { %v1155_v58 = vsel %vm145_vm2, %v1154_v57, 0.0 }
 0x8ed   :  { %1156 = vadd.xlane.f32.xlu1 %v1155_v58 }
 0x976   :  { %v1157_v60 = vpop.xlane.xlu1 %1156 }
 0x977   :  { %v1158_v18 = vmul.f32 0.03125, %v1157_v60  ;;  %v1584_v60 = vld [vmem:[%s2417_s4 + $0xa5] ss:$0 sm:$0xff] }
 0x979   :  { %v1159_v62 = vsub.f32 %v1154_v57, %v1158_v18 }
 0x97b   :  { %v1160_v33 = vmul.f32 %v1159_v62, %v1159_v62 }
 0x97d   :  { %v1161_v1 = vsel %vm145_vm2, %v1160_v33, 0.0 }
 0x97e   :  { %1162 = vadd.xlane.f32.xlu0 %v1161_v1 }
 0x982   :  { %956 = vadd.xlane.f32.xlu0 %v955_v6 }
 0x986   :  { %486 = vadd.xlane.f32.xlu0 %v485_v8 }
 0xa07   :  { %v1163_v28 = vpop.xlane.xlu0 %1162 }
 0xa08   :  { %v1164_v29 = vmul.f32 0.03125, %v1163_v28 }
 0xa0a   :  { %v1165_v21 = vadd.f32 1e-05, %v1164_v29 }
 0xa0c   :  { %1919 = vrsqrt.f32 %v1165_v21 }
 0xa19   :  { %v1920_v17 = vpop.eup %1919 }
 0xa1a   :  { %v1167_v30 = vmul.f32 %v1920_v17, %v1159_v62  ;;  %v957_v62 = vpop.xlane.xlu0 %956 }
 0xa1b   :  { %v958_v33 = vadd.f32 %v1497_v31, %v957_v62 }
 0xa1c   :  { %v1168_v34 = vmul.f32 %v1580_v22, %v1167_v30 }
 0xa1e   :  { %v1169_v35 = vadd.f32 %v1581_v32, %v1168_v34  ;;  %v487_v4 = vpop.xlane.xlu0 %486 }
 0xa1f   :  { %v488_v7 = vadd.f32 %v487_v4, %v39_v2 }
 0xa20   :  { %v1170_v36 = vpack.c.bf16 %v1169_v35, %v1169_v35 }
 0xa22   :  { %1607 = vmatmul.mubr.msk.bf16.vlgmr.msra.gmra.mxu0 %vm145_vm2, %v1170_v36 }
 0xae2   :  { %v1244_v46 = vpop.f32.mrf.mxu0 }
 0xae3   :  { %v1245_v47 = vadd.f32 %v1244_v46, %v1180_v44 }
 0xae4   :  { %v1246_v48 = vpop.f32.mrf.mxu0 }
 0xae5   :  { %v1247_v38 = vadd.f32 %v1246_v48, %v1184_v45  ;;  %v1251_v41 = vmax.f32 %v1245_v47, 0.0 }
 0xae6   :  { %v1248_v50 = vpop.f32.mrf.mxu0 }
 0xae7   :  { %v1252_v51 = vmax.f32 %v1247_v38, 0.0  ;;  %v1253_v54 = vpack.c.bf16 %v1251_v41, %v1251_v41 }
 0xae8   :  { %v1249_v52 = vpop.f32.mrf.mxu0 }
 0xae9   :  { %v1254_v53 = vpack.c.bf16 %v1252_v51, %v1252_v51 }
 0xaeb   :  { %1416 = vmatprep.mubr.bf16.mxu1 %v1254_v53 }
 0xaec   :  { %1417 = vmatmul.mubr.bf16.vlgmr.msra.gmra.mxu1 %v1253_v54 }
 0xbac   :  { %v1734_v55 = vpop.f32.mrf.mxu1 }
 0xbae   :  { %v1735_v3 = vpop.f32.mrf.mxu1 }
 0xbaf   :  { %v1736_v57 = vadd.f32 %v1735_v3, %v1734_v55 }
 0xbb0   :  { %v1737_v5 = vpop.f32.mrf.mxu1 }
 0xbb1   :  { %v1419_v58 = vadd.f32 %v1736_v57, %v1583_v56 }
 0xbb2   :  { %v1738_v59 = vpop.f32.mrf.mxu1 }
 0xbb3   :  { %v1424_v18 = vmax.f32 %v1419_v58, 0.0 }
 0xbb5   :  { %v1425_v61 = vmul.f32 %v1584_v60, %v1424_v18 }
 0xbb7   :  { %1426 = vadd.xlane.f32.xlu1 %v1425_v61 }
 0xbc8   :  { %1430 = vrot.lane.b32.xlu1 %v958_v33, %s1924_s27 }
 0xc40   :  { %v1427_v49 = vpop.xlane.xlu1 %1426 }
 0xc41   :  { %v1428_v1 = vadd.f32 %v1585_v63, %v1427_v49 }
 0xc43   :  { %1434 = vrot.lane.b32.xlu0 %v1428_v1, %s1925_s29 }
 0xc44   :  { %v1431_v6 = vpop.permute.xlu1 %1430 }
 0xc45   :  { %v1438_v8 = vsel %vm1437_vm3, %v488_v7, %v1431_v6 }
 0xcb5   :  { %v1435_v13 = vpop.permute.xlu0 %1434 }
 0xcb6   :  { %v1440_v9 = vsel %vm1439_vm4, %v1438_v8, %v1435_v13 }
 0xcb7   :  { %1442 = vst.msk [vmem:[%s2420_s5] sm:$0xff] %vm1441_vm5, %v1440_v9 }

</bundles_post_ra>
